<compile_context>
chip_gen: v6e
topology: v6e:2x2x1
jax: 0.10.0
libtpu: 0.0.40
codegen_flags: <defaults>
</compile_context>

<pallas_src>
import jax
import jax.numpy as jnp
from jax.experimental import pallas as pl
from jax.experimental.pallas import tpu as pltpu

EPS = 1e-3
IN_DIM = 300
IN_PAD = 384      # K padded to a 128-multiple (zero rows contribute nothing)
HID = 512
EMB = 1024
TN = 256          # fc2 output-feature tile: lane-dense, 1024/256 = 4 grid steps


def _bn_relu(h, gamma, beta):
    """Training-mode BatchNorm1d + ReLU as a fused affine (f32 throughout).

    Per-feature stats in one pass; the big [B,F] tensor only sees one
    multiply-add + max.  rsqrt lands on the EUP slot (effectively free).
    """
    inv_n = 1.0 / h.shape[0]
    mu = jnp.sum(h, axis=0, keepdims=True) * inv_n
    var = jnp.sum(h * h, axis=0, keepdims=True) * inv_n - mu * mu   # biased var
    scale = gamma * jax.lax.rsqrt(var + EPS)
    shift = beta - mu * scale
    return jnp.maximum(h * scale + shift, 0.0)


def super_tags_kernel(x_ref, w1_ref, g1_ref, be1_ref,
                      w2_ref, g2_ref, be2_ref, out_ref, h_ref):
    # fc1 (Linear 300->512 + BN + ReLU) computed once, on the first grid step,
    # into a persistent VMEM scratch.  Linear biases are omitted: the BN
    # batch-mean subtraction cancels any additive bias exactly.
    @pl.when(pl.program_id(0) == 0)
    def _():
        h = jnp.dot(x_ref[...], w1_ref[...], preferred_element_type=jnp.float32)
        h = _bn_relu(h, g1_ref[...], be1_ref[...])
        h_ref[...] = h.astype(h_ref.dtype)            # keep h in bf16 for the MXU

    # fc2 (Linear 512->1024 + BN + ReLU), tiled over output features.
    y = jnp.dot(h_ref[...], w2_ref[...], preferred_element_type=jnp.float32)
    y = _bn_relu(y, g2_ref[...], be2_ref[...])
    out_ref[...] = y.astype(out_ref.dtype)


@jax.jit
def super_tags_forward(x, params):
    (w1, b1, g1, be1, w2, b2, g2, be2) = params
    del b1, b2   # dead parameters: cancelled by BN's batch-mean subtraction
    B = x.shape[0]

    # Wrapper-side prep: pad K to 384 and ship matmul operands as bf16.
    x_p = jnp.pad(x, ((0, 0), (0, IN_PAD - IN_DIM))).astype(jnp.bfloat16)
    w1_p = jnp.pad(w1, ((0, IN_PAD - IN_DIM), (0, 0))).astype(jnp.bfloat16)
    w2_b = w2.astype(jnp.bfloat16)

    resident = lambda j: (0, 0)
    flops = 2 * B * (IN_PAD * HID + HID * EMB)
    bytes_accessed = ((x_p.size + w1_p.size + w2_b.size) * 2
                      + (g1.size + be1.size + g2.size + be2.size) * 4
                      + B * EMB * 4)

    return pl.pallas_call(
        super_tags_kernel,
        out_shape=jax.ShapeDtypeStruct((B, EMB), jnp.float32),
        grid_spec=pltpu.PrefetchScalarGridSpec(
            num_scalar_prefetch=0,
            grid=(EMB // TN,),
            in_specs=[
                pl.BlockSpec((B, IN_PAD), resident),        # x        (resident)
                pl.BlockSpec((IN_PAD, HID), resident),      # w1       (resident)
                pl.BlockSpec((1, HID), resident),           # gamma1   (resident)
                pl.BlockSpec((1, HID), resident),           # beta1    (resident)
                pl.BlockSpec((HID, TN), lambda j: (0, j)),  # w2 tile  (double-buffered)
                pl.BlockSpec((1, TN), lambda j: (0, j)),    # gamma2 tile
                pl.BlockSpec((1, TN), lambda j: (0, j)),    # beta2 tile
            ],
            out_specs=pl.BlockSpec((B, TN), lambda j: (0, j)),
            scratch_shapes=[pltpu.VMEM((B, HID), jnp.bfloat16)],   # fc1 activations
        ),
        compiler_params=pltpu.CompilerParams(
            # "arbitrary": later feature tiles reuse the h scratch written at
            # j == 0, so this axis cannot be sharded across v7x's two cores.
            # TODO(synk): for large B, split fc1/fc2 into two pallas_calls so the
            # fc2 feature axis can be marked "parallel" on v7x (2 TensorCores).
            dimension_semantics=("arbitrary",),
        ),
        cost_estimate=pl.CostEstimate(
            flops=flops, transcendentals=HID + EMB, bytes_accessed=bytes_accessed),
    )(x_p, w1_p, g1, be1, w2_b, g2, be2)


def init_params(key, in_dim=IN_DIM, hid=HID, emb=EMB):
    k1, k2, k3, k4, k5, k6, k7, k8 = jax.random.split(key, 8)
    bound1 = 1.0 / jnp.sqrt(in_dim)
    bound2 = 1.0 / jnp.sqrt(hid)
    w1 = jax.random.uniform(k1, (in_dim, hid), jnp.float32, -bound1, bound1)
    b1 = jax.random.uniform(k2, (1, hid), jnp.float32, -bound1, bound1)
    w2 = jax.random.uniform(k3, (hid, emb), jnp.float32, -bound2, bound2)
    b2 = jax.random.uniform(k4, (1, emb), jnp.float32, -bound2, bound2)
    # non-trivial BN affine params to exercise gamma/beta handling
    g1 = 1.0 + 0.1 * jax.random.normal(k5, (1, hid), jnp.float32)
    be1 = 0.1 * jax.random.normal(k6, (1, hid), jnp.float32)
    g2 = 1.0 + 0.1 * jax.random.normal(k7, (1, emb), jnp.float32)
    be2 = 0.1 * jax.random.normal(k8, (1, emb), jnp.float32)
    return (w1, b1, g1, be1, w2, b2, g2, be2)


def _bn_relu_ref(h, g, b):
    mu = jnp.mean(h, axis=0, keepdims=True)
    var = jnp.mean((h - mu) ** 2, axis=0, keepdims=True)
    return jnp.maximum((h - mu) / jnp.sqrt(var + EPS) * g + b, 0.0)


def reference_forward_f32(x, params):
    """PyTorch-faithful forward: f32 matmuls, Linear biases, batch-stat BN."""
    (w1, b1, g1, be1, w2, b2, g2, be2) = params
    h = _bn_relu_ref(x @ w1 + b1, g1, be1)
    return _bn_relu_ref(h @ w2 + b2, g2, be2)


def reference_forward_matched(x, params):
    """Numerics-matched reference: bf16 matmul operands, f32 BN, biases dropped."""
    (w1, b1, g1, be1, w2, b2, g2, be2) = params
    h = jnp.dot(x.astype(jnp.bfloat16), w1.astype(jnp.bfloat16),
                preferred_element_type=jnp.float32)
    h = _bn_relu_ref(h, g1, be1).astype(jnp.bfloat16)
    y = jnp.dot(h, w2.astype(jnp.bfloat16), preferred_element_type=jnp.float32)
    return _bn_relu_ref(y, g2, be2)


if __name__ == "__main__":
    key = jax.random.PRNGKey(0)
    kx, kp = jax.random.split(key)

    B = 8                                               # small batch (>= 2 for batch stats)
    x = jax.random.normal(kx, (B, IN_DIM), jnp.float32)  # tag embeddings [B, 300]
    params = init_params(kp)

    out = jax.block_until_ready(super_tags_forward(x, params))
    assert out.shape == (B, EMB), out.shape

    # Tight check vs. a reference with identical numerics (bf16 matmuls, f32 BN).
    ref_m = reference_forward_matched(x, params)
    err_m = float(jnp.max(jnp.abs(out - ref_m)))
    assert jnp.allclose(out, ref_m, atol=2e-3, rtol=2e-3), err_m

    # Sanity check vs. the PyTorch-faithful full-f32 forward (bf16 matmul slack).
    ref_f = reference_forward_f32(x, params)
    err_f = float(jnp.max(jnp.abs(out - ref_f)))
    assert jnp.allclose(out, ref_f, atol=1e-1, rtol=1e-1), err_f

    print("KERNEL_OK")
</pallas_src>

<mosaic_0001>
module attributes {stable_mosaic.version = 11 : i64} {
  func.func @super_tags_kernel(%arg0: i32, %arg1: memref<8x384xbf16, #tpu.memory_space<vmem>>, %arg2: memref<384x512xbf16, #tpu.memory_space<vmem>>, %arg3: memref<1x512xf32, #tpu.memory_space<vmem>>, %arg4: memref<1x512xf32, #tpu.memory_space<vmem>>, %arg5: memref<512x256xbf16, #tpu.memory_space<vmem>>, %arg6: memref<1x256xf32, #tpu.memory_space<vmem>>, %arg7: memref<1x256xf32, #tpu.memory_space<vmem>>, %arg8: memref<8x256xf32, #tpu.memory_space<vmem>>, %arg9: memref<8x512xbf16, #tpu.memory_space<vmem>>) attributes {dimension_semantics = [#tpu.dimension_semantics<arbitrary>], iteration_bounds = array<i64: 4>, scalar_prefetch = 0 : i64, scratch_operands = 1 : i64, tpu.core_type = #tpu.core_type<tc>, window_params = [{pipeline_mode = #tpu.pipeline_mode<synchronous>, transform_indices = @transform_0, window_bounds = array<i64: 8, 384>}, {pipeline_mode = #tpu.pipeline_mode<synchronous>, transform_indices = @transform_1, window_bounds = array<i64: 384, 512>}, {pipeline_mode = #tpu.pipeline_mode<synchronous>, transform_indices = @transform_2, window_bounds = array<i64: 1, 512>}, {pipeline_mode = #tpu.pipeline_mode<synchronous>, transform_indices = @transform_3, window_bounds = array<i64: 1, 512>}, {transform_indices = @transform_4, window_bounds = array<i64: 512, 256>}, {transform_indices = @transform_5, window_bounds = array<i64: 1, 256>}, {transform_indices = @transform_6, window_bounds = array<i64: 1, 256>}, {transform_indices = @transform_7, window_bounds = array<i64: 8, 256>}]} {
    %c0_i32 = arith.constant 0 : i32
    %0 = arith.cmpi eq, %arg0, %c0_i32 : i32
    %1 = arith.extui %0 : i1 to i32
    %c0_i32_0 = arith.constant 0 : i32
    %2 = arith.cmpi ne, %1, %c0_i32_0 : i32
    scf.if %2 {
      %c0_16 = arith.constant 0 : index
      %c0_17 = arith.constant 0 : index
      %32 = vector.load %arg1[%c0_16, %c0_17] : memref<8x384xbf16, #tpu.memory_space<vmem>>, vector<8x384xbf16>
      %c0_18 = arith.constant 0 : index
      %c0_19 = arith.constant 0 : index
      %33 = vector.load %arg2[%c0_18, %c0_19] : memref<384x512xbf16, #tpu.memory_space<vmem>>, vector<384x512xbf16>
      %cst_20 = arith.constant dense<0.000000e+00> : vector<8x512xf32>
      %34 = tpu.matmul %32, %33, %cst_20 {dimension_numbers = #tpu.dot_dimension_numbers<[1], [0], [0], [1], [0, 0, 1, 1], [], []>} : vector<8x384xbf16>, vector<384x512xbf16>, vector<8x512xf32> -> vector<8x512xf32>
      %c0_21 = arith.constant 0 : index
      %c0_22 = arith.constant 0 : index
      %35 = vector.load %arg3[%c0_21, %c0_22] : memref<1x512xf32, #tpu.memory_space<vmem>>, vector<1x512xf32>
      %c0_23 = arith.constant 0 : index
      %c0_24 = arith.constant 0 : index
      %36 = vector.load %arg4[%c0_23, %c0_24] : memref<1x512xf32, #tpu.memory_space<vmem>>, vector<1x512xf32>
      %cst_25 = arith.constant dense<0.000000e+00> : vector<512xf32>
      %37 = vector.multi_reduction <add>, %34, %cst_25 [0] : vector<8x512xf32> to vector<512xf32>
      %38 = vector.shape_cast %37 : vector<512xf32> to vector<1x512xf32>
      %cst_26 = arith.constant 1.250000e-01 : f32
      %39 = vector.broadcast %cst_26 : f32 to vector<1x512xf32>
      %40 = arith.mulf %38, %39 : vector<1x512xf32>
      %41 = arith.mulf %34, %34 : vector<8x512xf32>
      %cst_27 = arith.constant dense<0.000000e+00> : vector<512xf32>
      %42 = vector.multi_reduction <add>, %41, %cst_27 [0] : vector<8x512xf32> to vector<512xf32>
      %43 = vector.shape_cast %42 : vector<512xf32> to vector<1x512xf32>
      %cst_28 = arith.constant 1.250000e-01 : f32
      %44 = vector.broadcast %cst_28 : f32 to vector<1x512xf32>
      %45 = arith.mulf %43, %44 : vector<1x512xf32>
      %46 = arith.mulf %40, %40 : vector<1x512xf32>
      %47 = arith.subf %45, %46 : vector<1x512xf32>
      %cst_29 = arith.constant 1.000000e-03 : f32
      %48 = vector.broadcast %cst_29 : f32 to vector<1x512xf32>
      %49 = arith.addf %47, %48 : vector<1x512xf32>
      %50 = math.rsqrt %49 : vector<1x512xf32>
      %51 = arith.mulf %35, %50 : vector<1x512xf32>
      %52 = arith.mulf %40, %51 : vector<1x512xf32>
      %53 = arith.subf %36, %52 : vector<1x512xf32>
      %54 = vector.broadcast %51 : vector<1x512xf32> to vector<8x512xf32>
      %55 = arith.mulf %34, %54 : vector<8x512xf32>
      %56 = vector.broadcast %53 : vector<1x512xf32> to vector<8x512xf32>
      %57 = arith.addf %55, %56 : vector<8x512xf32>
      %cst_30 = arith.constant 0.000000e+00 : f32
      %58 = vector.broadcast %cst_30 : f32 to vector<8x512xf32>
      %59 = arith.maximumf %57, %58 : vector<8x512xf32>
      %60 = arith.truncf %59 : vector<8x512xf32> to vector<8x512xbf16>
      %c0_31 = arith.constant 0 : index
      %c0_32 = arith.constant 0 : index
      %61 = vector.load %arg9[%c0_31, %c0_32] : memref<8x512xbf16, #tpu.memory_space<vmem>>, vector<8x512xbf16>
      tpu.vector_store %arg9[%c0_31, %c0_32], %60 {strides = array<i32>} : memref<8x512xbf16, #tpu.memory_space<vmem>>, vector<8x512xbf16>,
    } else {
    }
    %c0 = arith.constant 0 : index
    %c0_1 = arith.constant 0 : index
    %3 = vector.load %arg9[%c0, %c0_1] : memref<8x512xbf16, #tpu.memory_space<vmem>>, vector<8x512xbf16>
    %c0_2 = arith.constant 0 : index
    %c0_3 = arith.constant 0 : index
    %4 = vector.load %arg5[%c0_2, %c0_3] : memref<512x256xbf16, #tpu.memory_space<vmem>>, vector<512x256xbf16>
    %cst = arith.constant dense<0.000000e+00> : vector<8x256xf32>
    %5 = tpu.matmul %3, %4, %cst {dimension_numbers = #tpu.dot_dimension_numbers<[1], [0], [0], [1], [0, 0, 1, 1], [], []>} : vector<8x512xbf16>, vector<512x256xbf16>, vector<8x256xf32> -> vector<8x256xf32>
    %c0_4 = arith.constant 0 : index
    %c0_5 = arith.constant 0 : index
    %6 = vector.load %arg6[%c0_4, %c0_5] : memref<1x256xf32, #tpu.memory_space<vmem>>, vector<1x256xf32>
    %c0_6 = arith.constant 0 : index
    %c0_7 = arith.constant 0 : index
    %7 = vector.load %arg7[%c0_6, %c0_7] : memref<1x256xf32, #tpu.memory_space<vmem>>, vector<1x256xf32>
    %cst_8 = arith.constant dense<0.000000e+00> : vector<256xf32>
    %8 = vector.multi_reduction <add>, %5, %cst_8 [0] : vector<8x256xf32> to vector<256xf32>
    %9 = vector.shape_cast %8 : vector<256xf32> to vector<1x256xf32>
    %cst_9 = arith.constant 1.250000e-01 : f32
    %10 = vector.broadcast %cst_9 : f32 to vector<1x256xf32>
    %11 = arith.mulf %9, %10 : vector<1x256xf32>
    %12 = arith.mulf %5, %5 : vector<8x256xf32>
    %cst_10 = arith.constant dense<0.000000e+00> : vector<256xf32>
    %13 = vector.multi_reduction <add>, %12, %cst_10 [0] : vector<8x256xf32> to vector<256xf32>
    %14 = vector.shape_cast %13 : vector<256xf32> to vector<1x256xf32>
    %cst_11 = arith.constant 1.250000e-01 : f32
    %15 = vector.broadcast %cst_11 : f32 to vector<1x256xf32>
    %16 = arith.mulf %14, %15 : vector<1x256xf32>
    %17 = arith.mulf %11, %11 : vector<1x256xf32>
    %18 = arith.subf %16, %17 : vector<1x256xf32>
    %cst_12 = arith.constant 1.000000e-03 : f32
    %19 = vector.broadcast %cst_12 : f32 to vector<1x256xf32>
    %20 = arith.addf %18, %19 : vector<1x256xf32>
    %21 = math.rsqrt %20 : vector<1x256xf32>
    %22 = arith.mulf %6, %21 : vector<1x256xf32>
    %23 = arith.mulf %11, %22 : vector<1x256xf32>
    %24 = arith.subf %7, %23 : vector<1x256xf32>
    %25 = vector.broadcast %22 : vector<1x256xf32> to vector<8x256xf32>
    %26 = arith.mulf %5, %25 : vector<8x256xf32>
    %27 = vector.broadcast %24 : vector<1x256xf32> to vector<8x256xf32>
    %28 = arith.addf %26, %27 : vector<8x256xf32>
    %cst_13 = arith.constant 0.000000e+00 : f32
    %29 = vector.broadcast %cst_13 : f32 to vector<8x256xf32>
    %30 = arith.maximumf %28, %29 : vector<8x256xf32>
    %c0_14 = arith.constant 0 : index
    %c0_15 = arith.constant 0 : index
    %31 = vector.load %arg8[%c0_14, %c0_15] : memref<8x256xf32, #tpu.memory_space<vmem>>, vector<8x256xf32>
    tpu.vector_store %arg8[%c0_14, %c0_15], %30 {strides = array<i32>} : memref<8x256xf32, #tpu.memory_space<vmem>>, vector<8x256xf32>,
    return
  }
  func.func @transform_0(%arg0: i32) -> (i32, i32) {
    %c0_i32 = arith.constant 0 : i32
    %c0_i32_0 = arith.constant 0 : i32
    %c0_i32_1 = arith.constant 0 : i32
    return %c0_i32, %c0_i32_0 : i32, i32
  }
  func.func @transform_1(%arg0: i32) -> (i32, i32) {
    %c0_i32 = arith.constant 0 : i32
    %c0_i32_0 = arith.constant 0 : i32
    %c0_i32_1 = arith.constant 0 : i32
    return %c0_i32, %c0_i32_0 : i32, i32
  }
  func.func @transform_2(%arg0: i32) -> (i32, i32) {
    %c0_i32 = arith.constant 0 : i32
    %c0_i32_0 = arith.constant 0 : i32
    %c0_i32_1 = arith.constant 0 : i32
    return %c0_i32, %c0_i32_0 : i32, i32
  }
  func.func @transform_3(%arg0: i32) -> (i32, i32) {
    %c0_i32 = arith.constant 0 : i32
    %c0_i32_0 = arith.constant 0 : i32
    %c0_i32_1 = arith.constant 0 : i32
    return %c0_i32, %c0_i32_0 : i32, i32
  }
  func.func @transform_4(%arg0: i32) -> (i32, i32) {
    %c0_i32 = arith.constant 0 : i32
    %c0_i32_0 = arith.constant 0 : i32
    return %c0_i32, %arg0 : i32, i32
  }
  func.func @transform_5(%arg0: i32) -> (i32, i32) {
    %c0_i32 = arith.constant 0 : i32
    %c0_i32_0 = arith.constant 0 : i32
    return %c0_i32, %arg0 : i32, i32
  }
  func.func @transform_6(%arg0: i32) -> (i32, i32) {
    %c0_i32 = arith.constant 0 : i32
    %c0_i32_0 = arith.constant 0 : i32
    return %c0_i32, %arg0 : i32, i32
  }
  func.func @transform_7(%arg0: i32) -> (i32, i32) {
    %c0_i32 = arith.constant 0 : i32
    %c0_i32_0 = arith.constant 0 : i32
    return %c0_i32, %arg0 : i32, i32
  }
}

</mosaic_0001>

<bundles_post_ra>
// kernel: super_tags_forward.1
= control target key start
LH: loop header
LB: loop body
LE: loop exit
PB: predicated region body
PF: predicated region fallthrough
CT: control target
= control target key end

     0   :  { %s3551_s0 = inlined_call_operand.vmem [shape: bf16[8,384], index: 0, kind: input, shape index: {}]   ;;  %s3552_s1 = inlined_call_operand.vmem [shape: bf16[384,512], index: 1, kind: input, shape index: {}]   ;;  %s3553_s2 = inlined_call_operand.vmem [shape: f32[1,512], index: 2, kind: input, shape index: {}]   ;;  %s3554_s3 = inlined_call_operand.vmem [shape: f32[1,512], index: 3, kind: input, shape index: {}]   ;;  %s3555_s4 = inlined_call_operand.vmem [shape: bf16[512,1024], index: 4, kind: input, shape index: {}]   ;;  %s3556_s5 = inlined_call_operand.vmem [shape: f32[1,1024], index: 5, kind: input, shape index: {}]   ;;  %s3557_s6 = inlined_call_operand.vmem [shape: f32[1,1024], index: 6, kind: input, shape index: {}]   ;;  %s3558_s7 = inlined_call_operand.hbm [shape: f32[8,1024], index: 7, kind: output, shape index: {}]  }
   0x1   :  { %3559 = sst [smem:[#allocation8_spill]] %s3555_s4 }
   0x2   :  { %12 = vsyncpa [#allocation5], 0 }
   0x3   :  { %14 = vsyncpa [#allocation5 + $0x1], 0  ;;  %s2864_s24 = smov 0   ;;  %s2866_s25 = smov 0  }
   0x4   :  { %s2868_s26 = smov 0   ;;  %s2870_s27 = smov 0  }
   0x5 LB: > { %s2885_s28 = sadd.s32 4294967295, %s2818_s27   ;;  %s2267_s29 = sadd.s32 4294967294, %s2818_s27   ;;  %s2818_s27 = sphi %s2870_s27, %s3568_s27   ;;  %s2814_s26 = sphi %s2868_s26, %s3567_s26   ;;  %s2810_s25 = sphi %s2866_s25, %s3566_s25   ;;  %s2806_s24 = sphi %s2864_s24, %s3565_s24  }
   0x6   : > { %s2889_s30 = sadd.s32 1, %s2818_s27   ;;  %s111_s8 = sadd.s32 1, %s2814_s26 }
   0x7   : > { %s108_s9 = ssub.s32 %s2818_s27, %s2889_s30  ;;  %p118_p0 = scmp.ne.s32.totalorder %s2814_s26, %s2810_s25 }
   0x8   : > { %p109_p1 = scmp.eq.s32.totalorder %s108_s9, 0  ;;  %p119_p2 = scmp.eq.s32.totalorder %s2818_s27, 0 }
   0x9   : > { %p200_p3 = scmp.eq.s32.totalorder %s2885_s28, 3  ;;  %p205_p4 = scmp.ne.s32.totalorder %s2810_s25, %s2806_s24 }
   0xa   : > { %s2901_s10 = scalar_select %p109_p1, %s2814_s26, %s111_s8  }
   0xb   : > { %p120_p5 = por %p119_p2, %p118_p0  ;;  %p2903_p6 = por %p200_p3, %p118_p0 }
   0xc   : > { %3560 = sst [smem:[#allocation7_spill]] %s2901_s10  ;;  %p206_p7 = scmp.eq.s32.totalorder %s2267_s29, 3 }
   0xd   : > { %p2269_p9 = scmp.ge.s32.totalorder %s2818_s27, 4 }
   0xe   : > { %p2907_p8 = por %p206_p7, %p205_p4 }
   0xf   : > { %234 = sbr.rel (%p2269_p9) target bundleno = 94 (0x5e), region = 32 }
  0x14   : > { %237 = sbr.rel (!%p120_p5) target bundleno = 94 (0x5e), region = 36  ;;  %s239_s13 = sand.u32 (%p120_p5), 1, %s2814_s26  }
  0x15   : > { %s2453_s14 = sshll.u32 (%p120_p5), %s2818_s27, 3  ;;  %s2270_s15 = sshll.u32 (%p120_p5), %s239_s13, 9 }
  0x16   : > { %s3563_s4 = sld [smem:[#allocation8_spill]] (%p120_p5)  ;;  %s2922_s19 = scalar_lea.vmem (%p120_p5), [#allocation3], %s2270_s15 }
  0x1c   : > { %s2917_s18 = scalar_lea.vmem %s3563_s4, %s2453_s14 }
  0x1d   : > { %v399_v0 = vld [vmem:[%s2917_s18] sm:$0xff] }
  0x1e   : > { %v401_v1 = vld [vmem:[%s2917_s18 + $0x20] sm:$0xff]  ;;  %400 = vst [vmem:[%s2922_s19] sm:$0xff] %v399_v0 }
  0x1f   : > { %v403_v2 = vld [vmem:[%s2917_s18 + $0x40] sm:$0xff]  ;;  %402 = vst [vmem:[%s2922_s19 + $0x8] sm:$0xff] %v401_v1 }
  0x20   : > { %404 = vst [vmem:[%s2922_s19 + $0x10] sm:$0xff] %v403_v2  ;;  %v405_v3 = vld [vmem:[%s2917_s18 + $0x60] sm:$0xff] }
  0x21   : > { %v407_v4 = vld [vmem:[%s2917_s18 + $0x80] sm:$0xff]  ;;  %406 = vst [vmem:[%s2922_s19 + $0x18] sm:$0xff] %v405_v3 }
  0x22   : > { %v409_v5 = vld [vmem:[%s2917_s18 + $0xa0] sm:$0xff]  ;;  %408 = vst [vmem:[%s2922_s19 + $0x20] sm:$0xff] %v407_v4 }
  0x23   : > { %410 = vst [vmem:[%s2922_s19 + $0x28] sm:$0xff] %v409_v5  ;;  %v411_v6 = vld [vmem:[%s2917_s18 + $0xc0] sm:$0xff] }
  0x24   : > { %v413_v7 = vld [vmem:[%s2917_s18 + $0xe0] sm:$0xff]  ;;  %412 = vst [vmem:[%s2922_s19 + $0x30] sm:$0xff] %v411_v6 }
  0x25   : > { %v415_v8 = vld [vmem:[%s2917_s18 + $0x100] sm:$0xff]  ;;  %414 = vst [vmem:[%s2922_s19 + $0x38] sm:$0xff] %v413_v7 }
  0x26   : > { %416 = vst [vmem:[%s2922_s19 + $0x40] sm:$0xff] %v415_v8  ;;  %v417_v9 = vld [vmem:[%s2917_s18 + $0x120] sm:$0xff] }
  0x27   : > { %v419_v10 = vld [vmem:[%s2917_s18 + $0x140] sm:$0xff]  ;;  %418 = vst [vmem:[%s2922_s19 + $0x48] sm:$0xff] %v417_v9 }
  0x28   : > { %v421_v11 = vld [vmem:[%s2917_s18 + $0x160] sm:$0xff]  ;;  %420 = vst [vmem:[%s2922_s19 + $0x50] sm:$0xff] %v419_v10 }
  0x29   : > { %422 = vst [vmem:[%s2922_s19 + $0x58] sm:$0xff] %v421_v11  ;;  %v423_v12 = vld [vmem:[%s2917_s18 + $0x180] sm:$0xff] }
  0x2a   : > { %v425_v13 = vld [vmem:[%s2917_s18 + $0x1a0] sm:$0xff]  ;;  %424 = vst [vmem:[%s2922_s19 + $0x60] sm:$0xff] %v423_v12 }
  0x2b   : > { %v427_v14 = vld [vmem:[%s2917_s18 + $0x1c0] sm:$0xff]  ;;  %426 = vst [vmem:[%s2922_s19 + $0x68] sm:$0xff] %v425_v13 }
  0x2c   : > { %428 = vst [vmem:[%s2922_s19 + $0x70] sm:$0xff] %v427_v14  ;;  %v429_v15 = vld [vmem:[%s2917_s18 + $0x1e0] sm:$0xff] }
  0x2d   : > { %v431_v16 = vld [vmem:[%s2917_s18 + $0x200] sm:$0xff]  ;;  %430 = vst [vmem:[%s2922_s19 + $0x78] sm:$0xff] %v429_v15 }
  0x2e   : > { %v433_v17 = vld [vmem:[%s2917_s18 + $0x220] sm:$0xff]  ;;  %432 = vst [vmem:[%s2922_s19 + $0x80] sm:$0xff] %v431_v16 }
  0x2f   : > { %434 = vst [vmem:[%s2922_s19 + $0x88] sm:$0xff] %v433_v17  ;;  %v435_v18 = vld [vmem:[%s2917_s18 + $0x240] sm:$0xff] }
  0x30   : > { %v437_v19 = vld [vmem:[%s2917_s18 + $0x260] sm:$0xff]  ;;  %436 = vst [vmem:[%s2922_s19 + $0x90] sm:$0xff] %v435_v18 }
  0x31   : > { %v439_v20 = vld [vmem:[%s2917_s18 + $0x280] sm:$0xff]  ;;  %438 = vst [vmem:[%s2922_s19 + $0x98] sm:$0xff] %v437_v19 }
  0x32   : > { %440 = vst [vmem:[%s2922_s19 + $0xa0] sm:$0xff] %v439_v20  ;;  %v441_v21 = vld [vmem:[%s2917_s18 + $0x2a0] sm:$0xff] }
  0x33   : > { %v443_v22 = vld [vmem:[%s2917_s18 + $0x2c0] sm:$0xff]  ;;  %442 = vst [vmem:[%s2922_s19 + $0xa8] sm:$0xff] %v441_v21 }
  0x34   : > { %v445_v23 = vld [vmem:[%s2917_s18 + $0x2e0] sm:$0xff]  ;;  %444 = vst [vmem:[%s2922_s19 + $0xb0] sm:$0xff] %v443_v22 }
  0x35   : > { %446 = vst [vmem:[%s2922_s19 + $0xb8] sm:$0xff] %v445_v23  ;;  %v447_v24 = vld [vmem:[%s2917_s18 + $0x300] sm:$0xff] }
  0x36   : > { %v449_v25 = vld [vmem:[%s2917_s18 + $0x320] sm:$0xff]  ;;  %448 = vst [vmem:[%s2922_s19 + $0xc0] sm:$0xff] %v447_v24 }
  0x37   : > { %v451_v26 = vld [vmem:[%s2917_s18 + $0x340] sm:$0xff]  ;;  %450 = vst [vmem:[%s2922_s19 + $0xc8] sm:$0xff] %v449_v25 }
  0x38   : > { %452 = vst [vmem:[%s2922_s19 + $0xd0] sm:$0xff] %v451_v26  ;;  %v453_v27 = vld [vmem:[%s2917_s18 + $0x360] sm:$0xff] }
  0x39   : > { %v455_v28 = vld [vmem:[%s2917_s18 + $0x380] sm:$0xff]  ;;  %454 = vst [vmem:[%s2922_s19 + $0xd8] sm:$0xff] %v453_v27 }
  0x3a   : > { %v457_v29 = vld [vmem:[%s2917_s18 + $0x3a0] sm:$0xff]  ;;  %456 = vst [vmem:[%s2922_s19 + $0xe0] sm:$0xff] %v455_v28 }
  0x3b   : > { %458 = vst [vmem:[%s2922_s19 + $0xe8] sm:$0xff] %v457_v29  ;;  %v459_v30 = vld [vmem:[%s2917_s18 + $0x3c0] sm:$0xff] }
  0x3c   : > { %v461_v31 = vld [vmem:[%s2917_s18 + $0x3e0] sm:$0xff]  ;;  %460 = vst [vmem:[%s2922_s19 + $0xf0] sm:$0xff] %v459_v30 }
  0x3d   : > { %v463_v32 = vld [vmem:[%s2917_s18 + $0x400] sm:$0xff]  ;;  %462 = vst [vmem:[%s2922_s19 + $0xf8] sm:$0xff] %v461_v31 }
  0x3e   : > { %464 = vst [vmem:[%s2922_s19 + $0x100] sm:$0xff] %v463_v32  ;;  %v465_v33 = vld [vmem:[%s2917_s18 + $0x420] sm:$0xff] }
  0x3f   : > { %v467_v34 = vld [vmem:[%s2917_s18 + $0x440] sm:$0xff]  ;;  %466 = vst [vmem:[%s2922_s19 + $0x108] sm:$0xff] %v465_v33 }
  0x40   : > { %v469_v35 = vld [vmem:[%s2917_s18 + $0x460] sm:$0xff]  ;;  %468 = vst [vmem:[%s2922_s19 + $0x110] sm:$0xff] %v467_v34 }
  0x41   : > { %470 = vst [vmem:[%s2922_s19 + $0x118] sm:$0xff] %v469_v35  ;;  %v471_v36 = vld [vmem:[%s2917_s18 + $0x480] sm:$0xff] }
  0x42   : > { %v473_v37 = vld [vmem:[%s2917_s18 + $0x4a0] sm:$0xff]  ;;  %472 = vst [vmem:[%s2922_s19 + $0x120] sm:$0xff] %v471_v36 }
  0x43   : > { %v475_v38 = vld [vmem:[%s2917_s18 + $0x4c0] sm:$0xff]  ;;  %474 = vst [vmem:[%s2922_s19 + $0x128] sm:$0xff] %v473_v37 }
  0x44   : > { %476 = vst [vmem:[%s2922_s19 + $0x130] sm:$0xff] %v475_v38  ;;  %v477_v39 = vld [vmem:[%s2917_s18 + $0x4e0] sm:$0xff] }
  0x45   : > { %v479_v40 = vld [vmem:[%s2917_s18 + $0x500] sm:$0xff]  ;;  %478 = vst [vmem:[%s2922_s19 + $0x138] sm:$0xff] %v477_v39 }
  0x46   : > { %v481_v41 = vld [vmem:[%s2917_s18 + $0x520] sm:$0xff]  ;;  %480 = vst [vmem:[%s2922_s19 + $0x140] sm:$0xff] %v479_v40 }
  0x47   : > { %482 = vst [vmem:[%s2922_s19 + $0x148] sm:$0xff] %v481_v41  ;;  %v483_v42 = vld [vmem:[%s2917_s18 + $0x540] sm:$0xff] }
  0x48   : > { %v485_v43 = vld [vmem:[%s2917_s18 + $0x560] sm:$0xff]  ;;  %484 = vst [vmem:[%s2922_s19 + $0x150] sm:$0xff] %v483_v42 }
  0x49   : > { %v487_v44 = vld [vmem:[%s2917_s18 + $0x580] sm:$0xff]  ;;  %486 = vst [vmem:[%s2922_s19 + $0x158] sm:$0xff] %v485_v43 }
  0x4a   : > { %488 = vst [vmem:[%s2922_s19 + $0x160] sm:$0xff] %v487_v44  ;;  %v489_v45 = vld [vmem:[%s2917_s18 + $0x5a0] sm:$0xff] }
  0x4b   : > { %v491_v46 = vld [vmem:[%s2917_s18 + $0x5c0] sm:$0xff]  ;;  %490 = vst [vmem:[%s2922_s19 + $0x168] sm:$0xff] %v489_v45 }
  0x4c   : > { %v493_v47 = vld [vmem:[%s2917_s18 + $0x5e0] sm:$0xff]  ;;  %492 = vst [vmem:[%s2922_s19 + $0x170] sm:$0xff] %v491_v46 }
  0x4d   : > { %494 = vst [vmem:[%s2922_s19 + $0x178] sm:$0xff] %v493_v47  ;;  %v495_v48 = vld [vmem:[%s2917_s18 + $0x600] sm:$0xff] }
  0x4e   : > { %v497_v49 = vld [vmem:[%s2917_s18 + $0x620] sm:$0xff]  ;;  %496 = vst [vmem:[%s2922_s19 + $0x180] sm:$0xff] %v495_v48 }
  0x4f   : > { %v499_v50 = vld [vmem:[%s2917_s18 + $0x640] sm:$0xff]  ;;  %498 = vst [vmem:[%s2922_s19 + $0x188] sm:$0xff] %v497_v49 }
  0x50   : > { %500 = vst [vmem:[%s2922_s19 + $0x190] sm:$0xff] %v499_v50  ;;  %v501_v51 = vld [vmem:[%s2917_s18 + $0x660] sm:$0xff] }
  0x51   : > { %v503_v52 = vld [vmem:[%s2917_s18 + $0x680] sm:$0xff]  ;;  %502 = vst [vmem:[%s2922_s19 + $0x198] sm:$0xff] %v501_v51 }
  0x52   : > { %v505_v53 = vld [vmem:[%s2917_s18 + $0x6a0] sm:$0xff]  ;;  %504 = vst [vmem:[%s2922_s19 + $0x1a0] sm:$0xff] %v503_v52 }
  0x53   : > { %506 = vst [vmem:[%s2922_s19 + $0x1a8] sm:$0xff] %v505_v53  ;;  %v507_v54 = vld [vmem:[%s2917_s18 + $0x6c0] sm:$0xff] }
  0x54   : > { %v509_v55 = vld [vmem:[%s2917_s18 + $0x6e0] sm:$0xff]  ;;  %508 = vst [vmem:[%s2922_s19 + $0x1b0] sm:$0xff] %v507_v54 }
  0x55   : > { %v511_v56 = vld [vmem:[%s2917_s18 + $0x700] sm:$0xff]  ;;  %510 = vst [vmem:[%s2922_s19 + $0x1b8] sm:$0xff] %v509_v55 }
  0x56   : > { %512 = vst [vmem:[%s2922_s19 + $0x1c0] sm:$0xff] %v511_v56  ;;  %v513_v57 = vld [vmem:[%s2917_s18 + $0x720] sm:$0xff] }
  0x57   : > { %v515_v58 = vld [vmem:[%s2917_s18 + $0x740] sm:$0xff]  ;;  %514 = vst [vmem:[%s2922_s19 + $0x1c8] sm:$0xff] %v513_v57 }
  0x58   : > { %v517_v59 = vld [vmem:[%s2917_s18 + $0x760] sm:$0xff]  ;;  %516 = vst [vmem:[%s2922_s19 + $0x1d0] sm:$0xff] %v515_v58 }
  0x59   : > { %518 = vst [vmem:[%s2922_s19 + $0x1d8] sm:$0xff] %v517_v59  ;;  %v519_v60 = vld [vmem:[%s2917_s18 + $0x780] sm:$0xff] }
  0x5a   : > { %v521_v61 = vld [vmem:[%s2917_s18 + $0x7a0] sm:$0xff]  ;;  %520 = vst [vmem:[%s2922_s19 + $0x1e0] sm:$0xff] %v519_v60 }
  0x5b   : > { %v523_v62 = vld [vmem:[%s2917_s18 + $0x7c0] sm:$0xff]  ;;  %522 = vst [vmem:[%s2922_s19 + $0x1e8] sm:$0xff] %v521_v61 }
  0x5c   : > { %524 = vst [vmem:[%s2922_s19 + $0x1f0] sm:$0xff] %v523_v62  ;;  %v525_v63 = vld [vmem:[%s2917_s18 + $0x7e0] sm:$0xff] }
  0x5d   : > { %526 = vst [vmem:[%s2922_s19 + $0x1f8] sm:$0xff] %v525_v63 }
  0x5e PF: > { %p2273_p10 = scmp.ge.s32.totalorder %s2818_s27, 1  ;;  %p547_p11 = scmp.lt.s32.totalorder %s2818_s27, 5 }
  0x60   : > { %p548_p12 = pnand %p2273_p10, %p547_p11 }
  0x61   : > { %s3052_s20 = sand.u32 (!%p548_p12), 1, %s2810_s25   ;;  %s2276_s21 = sshll.u32 (!%p548_p12), %s2885_s28, 1 }
  0x62   : > { %551 = sbr.rel (%p548_p12) target bundleno = 806 (0x326), region = 82  ;;  %s2274_s22 = sshll.u32 (!%p548_p12), %s3052_s20, 9 }
  0x63   : > { %s2275_s23 = sshll.u32 (!%p548_p12), %s3052_s20, 4  ;;  %p595_p13 = scmp.lt.s32.totalorder (!%p548_p12), %s2276_s21, 7 }
  0x64   : > { %s3067_s16 = scalar_lea.vmem (!%p548_p12), [#allocation3], %s2274_s22  ;;  %s3069_s17 = scalar_lea.vmem (!%p548_p12), [#allocation4], %s2275_s23 }
  0x65   : > { %p2278_p0 = scmp.ne.s32.totalorder (!%p548_p12), %s2885_s28, 0 }
  0x67   : > { %s3570_s21 = smov (!%p595_p13, %s2276_s21), 7  ;;  %609 = sbr.rel (%p2278_p0) target bundleno = 470 (0x1d6), region = 90 }
  0x68   : > { %s597_s9 = scalar_lea.vmem %s3556_s5, %s3570_s21  ;;  %s602_s15 = scalar_lea.vmem %s3557_s6, %s3570_s21 }
  0x6c   : > { %v2499_v0 = vld [vmem:[%s3552_s1 + $0xe4] ss:$16 sps:$4 sm:$0xff]   ;;  %v2820_v2 = vmov 0   ;;  %v2503_v3 = vld [vmem:[%s3552_s1 + $0xe0] ss:$16 sps:$4 sm:$0xff]  }
  0x6d   : > { %v2501_v1 = vld [vmem:[%s3552_s1 + $0x2e4] ss:$16 sps:$4 sm:$0xff]   ;;  %1272 = vmatprep.mubr.bf16.mxu1 %v2820_v2  ;;  %1199 = vmatprep.subr.bf16.mxu0 %v2499_v0  ;;  %v2504_v4 = vld [vmem:[%s3552_s1 + $0x2e0] ss:$16 sps:$4 sm:$0xff]   ;;  %v2552_v34 = vld [vmem:[%s3552_s1 + $0xec] ss:$16 sps:$4 sm:$0xff]  }
  0x6e   : > { %1240 = vmatprep.subr.bf16.mxu1 %v2501_v1  ;;  %v2505_v5 = vld [vmem:[%s3552_s1 + $0xc4] ss:$16 sps:$4 sm:$0xff]   ;;  %1200 = vmatpush1.bf16.msra.mxu0 %v2503_v3  ;;  %v2509_v7 = vld [vmem:[%s3552_s1 + $0xc0] ss:$16 sps:$4 sm:$0xff]   ;;  %v3178_v35 = vld [vmem:[%s3551_s0 + $0x8] ss:$0 sps:$4 sm:$0xff]  }
  0x6f   : > { %1241 = vmatpush1.bf16.msra.mxu1 %v2504_v4  ;;  %v2507_v6 = vld [vmem:[%s3552_s1 + $0x2c4] ss:$16 sps:$4 sm:$0xff]   ;;  %1201 = vmatprep.subr.bf16.mxu0 %v2505_v5  ;;  %v2510_v8 = vld [vmem:[%s3552_s1 + $0x2c0] ss:$16 sps:$4 sm:$0xff]   ;;  %v2550_v36 = vld [vmem:[%s3552_s1 + $0xe8] ss:$16 sps:$4 sm:$0xff]  }
  0x70   : > { %1242 = vmatprep.subr.bf16.mxu1 %v2507_v6  ;;  %v2511_v9 = vld [vmem:[%s3552_s1 + $0xa4] ss:$16 sps:$4 sm:$0xff]   ;;  %v2515_v11 = vld [vmem:[%s3552_s1 + $0xa0] ss:$16 sps:$4 sm:$0xff]   ;;  %v2558_v39 = vld [vmem:[%s3552_s1 + $0xcc] ss:$16 sps:$4 sm:$0xff]  }
  0x71   : > { %v2513_v10 = vld [vmem:[%s3552_s1 + $0x2a4] ss:$16 sps:$4 sm:$0xff]   ;;  %v2516_v12 = vld [vmem:[%s3552_s1 + $0x2a0] ss:$16 sps:$4 sm:$0xff]   ;;  %v2556_v40 = vld [vmem:[%s3552_s1 + $0xc8] ss:$16 sps:$4 sm:$0xff]  }
  0x72   : > { %1202 = vmatpush1.bf16.msra.mxu0 %v2509_v7  ;;  %v2517_v13 = vld [vmem:[%s3552_s1 + $0x84] ss:$16 sps:$4 sm:$0xff]   ;;  %v2521_v15 = vld [vmem:[%s3552_s1 + $0x80] ss:$16 sps:$4 sm:$0xff]   ;;  %v2564_v43 = vld [vmem:[%s3552_s1 + $0xac] ss:$16 sps:$4 sm:$0xff]  }
  0x73   : > { %1243 = vmatpush1.bf16.msra.mxu1 %v2510_v8  ;;  %1203 = vmatprep.subr.bf16.mxu0 %v2511_v9  ;;  %v2519_v14 = vld [vmem:[%s3552_s1 + $0x284] ss:$16 sps:$4 sm:$0xff]   ;;  %v2522_v16 = vld [vmem:[%s3552_s1 + $0x280] ss:$16 sps:$4 sm:$0xff]   ;;  %v2562_v44 = vld [vmem:[%s3552_s1 + $0xa8] ss:$16 sps:$4 sm:$0xff]  }
  0x74   : > { %1244 = vmatprep.subr.bf16.mxu1 %v2513_v10  ;;  %v2523_v17 = vld [vmem:[%s3552_s1 + $0x64] ss:$16 sps:$4 sm:$0xff]   ;;  %v2527_v19 = vld [vmem:[%s3552_s1 + $0x60] ss:$16 sps:$4 sm:$0xff]   ;;  %v2570_v47 = vld [vmem:[%s3552_s1 + $0x8c] ss:$16 sps:$4 sm:$0xff]  }
  0x75   : > { %v2525_v18 = vld [vmem:[%s3552_s1 + $0x264] ss:$16 sps:$4 sm:$0xff]   ;;  %v2528_v20 = vld [vmem:[%s3552_s1 + $0x260] ss:$16 sps:$4 sm:$0xff]   ;;  %v2568_v48 = vld [vmem:[%s3552_s1 + $0x88] ss:$16 sps:$4 sm:$0xff]  }
  0x76   : > { %1204 = vmatpush1.bf16.msra.mxu0 %v2515_v11  ;;  %v2529_v21 = vld [vmem:[%s3552_s1 + $0x44] ss:$16 sps:$4 sm:$0xff]   ;;  %v2533_v23 = vld [vmem:[%s3552_s1 + $0x40] ss:$16 sps:$4 sm:$0xff]   ;;  %v2576_v53 = vld [vmem:[%s3552_s1 + $0x6c] ss:$16 sps:$4 sm:$0xff]  }
  0x77   : > { %1245 = vmatpush1.bf16.msra.mxu1 %v2516_v12  ;;  %1205 = vmatprep.subr.bf16.mxu0 %v2517_v13  ;;  %v2531_v22 = vld [vmem:[%s3552_s1 + $0x244] ss:$16 sps:$4 sm:$0xff]   ;;  %v2534_v24 = vld [vmem:[%s3552_s1 + $0x240] ss:$16 sps:$4 sm:$0xff]   ;;  %v2574_v54 = vld [vmem:[%s3552_s1 + $0x68] ss:$16 sps:$4 sm:$0xff]  }
  0x78   : > { %1246 = vmatprep.subr.bf16.mxu1 %v2519_v14  ;;  %v2535_v25 = vld [vmem:[%s3552_s1 + $0x24] ss:$16 sps:$4 sm:$0xff]   ;;  %v2539_v27 = vld [vmem:[%s3552_s1 + $0x20] ss:$16 sps:$4 sm:$0xff]   ;;  %v2582_v57 = vld [vmem:[%s3552_s1 + $0x4c] ss:$16 sps:$4 sm:$0xff]  }
  0x79   : > { %v2537_v26 = vld [vmem:[%s3552_s1 + $0x224] ss:$16 sps:$4 sm:$0xff]   ;;  %v2540_v28 = vld [vmem:[%s3552_s1 + $0x220] ss:$16 sps:$4 sm:$0xff]   ;;  %v2580_v58 = vld [vmem:[%s3552_s1 + $0x48] ss:$16 sps:$4 sm:$0xff]  }
  0x7a   : > { %1206 = vmatpush1.bf16.msra.mxu0 %v2521_v15  ;;  %v2541_v29 = vld [vmem:[%s3552_s1 + $0x4] ss:$16 sps:$4 sm:$0xff]   ;;  %v2545_v31 = vld [vmem:[%s3552_s1] ss:$16 sps:$4 sm:$0xff]   ;;  %v2588_v61 = vld [vmem:[%s3552_s1 + $0x2c] ss:$16 sps:$4 sm:$0xff]  }
  0x7b   : > { %1247 = vmatpush1.bf16.msra.mxu1 %v2522_v16  ;;  %1207 = vmatprep.subr.bf16.mxu0 %v2523_v17  ;;  %v2543_v30 = vld [vmem:[%s3552_s1 + $0x204] ss:$16 sps:$4 sm:$0xff]   ;;  %v2546_v32 = vld [vmem:[%s3552_s1 + $0x200] ss:$16 sps:$4 sm:$0xff]   ;;  %v2586_v62 = vld [vmem:[%s3552_s1 + $0x28] ss:$16 sps:$4 sm:$0xff]  }
  0x7c   : > { %1248 = vmatprep.subr.bf16.mxu1 %v2525_v18  ;;  %v2547_v33 = vld [vmem:[%s3552_s1 + $0x1e4] ss:$16 sps:$4 sm:$0xff]   ;;  %v2553_v37 = vld [vmem:[%s3552_s1 + $0x1e0] ss:$16 sps:$4 sm:$0xff]   ;;  %v2594_v1 = vld [vmem:[%s3552_s1 + $0xc] ss:$16 sps:$4 sm:$0xff]  }
  0x7d   : > { %v2554_v38 = vld [vmem:[%s3552_s1 + $0x1c4] ss:$16 sps:$4 sm:$0xff]   ;;  %v2559_v41 = vld [vmem:[%s3552_s1 + $0x1c0] ss:$16 sps:$4 sm:$0xff]   ;;  %v2592_v3 = vld [vmem:[%s3552_s1 + $0x8] ss:$16 sps:$4 sm:$0xff]  }
  0x7e   : > { %1208 = vmatpush1.bf16.msra.mxu0 %v2527_v19  ;;  %v2560_v42 = vld [vmem:[%s3552_s1 + $0x1a4] ss:$16 sps:$4 sm:$0xff]   ;;  %v2565_v45 = vld [vmem:[%s3552_s1 + $0x1a0] ss:$16 sps:$4 sm:$0xff]   ;;  %v2600_v5 = vld [vmem:[%s3552_s1 + $0x1ec] ss:$16 sps:$4 sm:$0xff]  }
  0x7f   : > { %1249 = vmatpush1.bf16.msra.mxu1 %v2528_v20  ;;  %1209 = vmatprep.subr.bf16.mxu0 %v2529_v21  ;;  %v2566_v46 = vld [vmem:[%s3552_s1 + $0x184] ss:$16 sps:$4 sm:$0xff]   ;;  %v2571_v50 = vld [vmem:[%s3552_s1 + $0x180] ss:$16 sps:$4 sm:$0xff]   ;;  %v2603_v6 = vld [vmem:[%s3552_s1 + $0x2ec] ss:$16 sps:$4 sm:$0xff]  }
  0x80   : > { %1250 = vmatprep.subr.bf16.mxu1 %v2531_v22  ;;  %v610_v49 = vld [vmem:[%s3551_s0] sm:$0xff]  ;;  %v2598_v8 = vld [vmem:[%s3552_s1 + $0x1e8] ss:$16 sps:$4 sm:$0xff]   ;;  %v2606_v10 = vld [vmem:[%s3552_s1 + $0x1cc] ss:$16 sps:$4 sm:$0xff]  }
  0x81   : > { %v2572_v51 = vld [vmem:[%s3552_s1 + $0x164] ss:$16 sps:$4 sm:$0xff]   ;;  %v2280_v52 = vcombine.high %v610_v49, %v610_v49  ;;  %v2577_v55 = vld [vmem:[%s3552_s1 + $0x160] ss:$16 sps:$4 sm:$0xff]   ;;  %v3280_v7 = vcombine.low %v610_v49, %v610_v49  ;;  %v2601_v9 = vld [vmem:[%s3552_s1 + $0x2e8] ss:$16 sps:$4 sm:$0xff]  }
  0x82   : > { %1210 = vmatpush1.bf16.msra.mxu0 %v2533_v23  ;;  %v2578_v56 = vld [vmem:[%s3552_s1 + $0x144] ss:$16 sps:$4 sm:$0xff]   ;;  %v2583_v59 = vld [vmem:[%s3552_s1 + $0x140] ss:$16 sps:$4 sm:$0xff]   ;;  %v2609_v11 = vld [vmem:[%s3552_s1 + $0x2cc] ss:$16 sps:$4 sm:$0xff]  }
  0x83   : > { %1251 = vmatpush1.bf16.msra.mxu1 %v2534_v24  ;;  %1211 = vmatprep.subr.bf16.mxu0 %v2535_v25  ;;  %v2584_v60 = vld [vmem:[%s3552_s1 + $0x124] ss:$16 sps:$4 sm:$0xff]   ;;  %v2589_v63 = vld [vmem:[%s3552_s1 + $0x120] ss:$16 sps:$4 sm:$0xff]   ;;  %v2604_v12 = vld [vmem:[%s3552_s1 + $0x1c8] ss:$16 sps:$4 sm:$0xff]  }
  0x84   : > { %1252 = vmatprep.subr.bf16.mxu1 %v2537_v26  ;;  %1231 = vmatprep.mubr.bf16.mxu0 %v2280_v52  ;;  %v2590_v0 = vld [vmem:[%s3552_s1 + $0x104] ss:$16 sps:$4 sm:$0xff]   ;;  %v2595_v4 = vld [vmem:[%s3552_s1 + $0x100] ss:$16 sps:$4 sm:$0xff]   ;;  %v2607_v13 = vld [vmem:[%s3552_s1 + $0x2c8] ss:$16 sps:$4 sm:$0xff]  }
  0x85   : > { %v2612_v14 = vld [vmem:[%s3552_s1 + $0x1ac] ss:$16 sps:$4 sm:$0xff]   ;;  %v2610_v16 = vld [vmem:[%s3552_s1 + $0x1a8] ss:$16 sps:$4 sm:$0xff]  }
  0x86   : > { %1212 = vmatpush1.bf16.msra.mxu0 %v2539_v27  ;;  %v2615_v15 = vld [vmem:[%s3552_s1 + $0x2ac] ss:$16 sps:$4 sm:$0xff]   ;;  %v2613_v17 = vld [vmem:[%s3552_s1 + $0x2a8] ss:$16 sps:$4 sm:$0xff]  }
  0x87   : > { %1253 = vmatpush1.bf16.msra.mxu1 %v2540_v28  ;;  %1213 = vmatprep.subr.bf16.mxu0 %v2541_v29  ;;  %v2618_v18 = vld [vmem:[%s3552_s1 + $0x18c] ss:$16 sps:$4 sm:$0xff]   ;;  %v2616_v19 = vld [vmem:[%s3552_s1 + $0x188] ss:$16 sps:$4 sm:$0xff]  }
  0x88   : > { %1254 = vmatprep.subr.bf16.mxu1 %v2543_v30  ;;  %v2619_v20 = vld [vmem:[%s3552_s1 + $0x288] ss:$16 sps:$4 sm:$0xff]   ;;  %v2624_v21 = vld [vmem:[%s3552_s1 + $0x16c] ss:$16 sps:$4 sm:$0xff]  }
  0x89   : > { %v2627_v22 = vld [vmem:[%s3552_s1 + $0x26c] ss:$16 sps:$4 sm:$0xff]   ;;  %v2622_v23 = vld [vmem:[%s3552_s1 + $0x168] ss:$16 sps:$4 sm:$0xff]  }
  0x8a   : > { %1214 = vmatpush1.bf16.msra.mxu0 %v2545_v31  ;;  %v2625_v24 = vld [vmem:[%s3552_s1 + $0x268] ss:$16 sps:$4 sm:$0xff]   ;;  %v2630_v25 = vld [vmem:[%s3552_s1 + $0x14c] ss:$16 sps:$4 sm:$0xff]  }
  0x8b   : > { %1255 = vmatpush1.bf16.msra.mxu1 %v2546_v32  ;;  %1215 = vmatprep.subr.bf16.mxu0 %v2547_v33  ;;  %v2633_v26 = vld [vmem:[%s3552_s1 + $0x24c] ss:$16 sps:$4 sm:$0xff]   ;;  %v2628_v27 = vld [vmem:[%s3552_s1 + $0x148] ss:$16 sps:$4 sm:$0xff]  }
  0x8c   : > { %1281 = vmatprep.subr.bf16.mxu1 %v2552_v34  ;;  %v2631_v28 = vld [vmem:[%s3552_s1 + $0x248] ss:$16 sps:$4 sm:$0xff]   ;;  %v2636_v29 = vld [vmem:[%s3552_s1 + $0x12c] ss:$16 sps:$4 sm:$0xff]  }
  0x8d   : > { %v2639_v30 = vld [vmem:[%s3552_s1 + $0x22c] ss:$16 sps:$4 sm:$0xff]   ;;  %v2634_v31 = vld [vmem:[%s3552_s1 + $0x128] ss:$16 sps:$4 sm:$0xff]  }
  0x8e   : > { %1273 = vmatmul.mubr.bf16.vlgmr.msra.gmra.mxu1 %v3178_v35  ;;  %1216 = vmatpush2.bf16.msra.mxu0 %v2553_v37  ;;  %v2637_v32 = vld [vmem:[%s3552_s1 + $0x228] ss:$16 sps:$4 sm:$0xff]   ;;  %v2642_v33 = vld [vmem:[%s3552_s1 + $0x10c] ss:$16 sps:$4 sm:$0xff]  }
  0x8f   : > { %1282 = vmatpush1.bf16.msra.mxu1 %v2550_v36  ;;  %1217 = vmatprep.subr.bf16.mxu0 %v2554_v38  ;;  %v2645_v34 = vld [vmem:[%s3552_s1 + $0x20c] ss:$16 sps:$4 sm:$0xff]   ;;  %v2640_v36 = vld [vmem:[%s3552_s1 + $0x108] ss:$16 sps:$4 sm:$0xff]  }
  0x90   : > { %1283 = vmatprep.subr.bf16.mxu1 %v2558_v39  ;;  %1313 = vmatprep.mubr.bf16.mxu1 %v2280_v52  ;;  %v2643_v37 = vld [vmem:[%s3552_s1 + $0x208] ss:$16 sps:$4 sm:$0xff]  }
  0x92   : > { %1218 = vmatpush2.bf16.msra.mxu0 %v2559_v41 }
  0x93   : > { %1284 = vmatpush1.bf16.msra.mxu1 %v2556_v40  ;;  %1219 = vmatprep.subr.bf16.mxu0 %v2560_v42 }
  0x94   : > { %1285 = vmatprep.subr.bf16.mxu1 %v2564_v43 }
  0x96   : > { %1220 = vmatpush2.bf16.msra.mxu0 %v2565_v45 }
  0x97   : > { %1286 = vmatpush1.bf16.msra.mxu1 %v2562_v44  ;;  %1221 = vmatprep.subr.bf16.mxu0 %v2566_v46 }
  0x98   : > { %1287 = vmatprep.subr.bf16.mxu1 %v2570_v47 }
  0x9a   : > { %1222 = vmatpush2.bf16.msra.mxu0 %v2571_v50 }
  0x9b   : > { %1288 = vmatpush1.bf16.msra.mxu1 %v2568_v48  ;;  %1223 = vmatprep.subr.bf16.mxu0 %v2572_v51 }
  0x9c   : > { %1289 = vmatprep.subr.bf16.mxu1 %v2576_v53 }
  0x9e   : > { %1224 = vmatpush2.bf16.msra.mxu0 %v2577_v55 }
  0x9f   : > { %1290 = vmatpush1.bf16.msra.mxu1 %v2574_v54  ;;  %1225 = vmatprep.subr.bf16.mxu0 %v2578_v56 }
  0xa0   : > { %1291 = vmatprep.subr.bf16.mxu1 %v2582_v57 }
  0xa2   : > { %1226 = vmatpush2.bf16.msra.mxu0 %v2583_v59 }
  0xa3   : > { %1292 = vmatpush1.bf16.msra.mxu1 %v2580_v58  ;;  %1227 = vmatprep.subr.bf16.mxu0 %v2584_v60 }
  0xa4   : > { %1293 = vmatprep.subr.bf16.mxu1 %v2588_v61 }
  0xa6   : > { %1228 = vmatpush2.bf16.msra.mxu0 %v2589_v63 }
  0xa7   : > { %1294 = vmatpush1.bf16.msra.mxu1 %v2586_v62  ;;  %1229 = vmatprep.subr.bf16.mxu0 %v2590_v0 }
  0xa8   : > { %1295 = vmatprep.subr.bf16.mxu1 %v2594_v1 }
  0xaa   : > { %1230 = vmatpush2.bf16.msra.mxu0 %v2595_v4 }
  0xab   : > { %1296 = vmatpush1.bf16.msra.mxu1 %v2592_v3  ;;  %1322 = vmatprep.subr.bf16.mxu0 %v2603_v6 }
  0xac   : > { %1297 = vmatprep.subr.bf16.mxu1 %v2600_v5 }
  0xad   : > { %1232 = vmatmul.mubr.bf16.vlgmr.msra.gmra.mxu0 %v3280_v7 }
  0xae   : > { %1323 = vmatpush1.bf16.msra.mxu0 %v2601_v9  ;;  %1354 = vmatprep.mubr.bf16.mxu0 %v2820_v2  ;;  %v2621_v2 = vld [vmem:[%s3552_s1 + $0x28c] ss:$16 sps:$4 sm:$0xff]  }
  0xaf   : > { %1298 = vmatpush2.bf16.msra.mxu1 %v2598_v8  ;;  %1324 = vmatprep.subr.bf16.mxu0 %v2609_v11 }
  0xb0   : > { %1299 = vmatprep.subr.bf16.mxu1 %v2606_v10 }
  0xb2   : > { %1325 = vmatpush1.bf16.msra.mxu0 %v2607_v13 }
  0xb3   : > { %1300 = vmatpush2.bf16.msra.mxu1 %v2604_v12  ;;  %1326 = vmatprep.subr.bf16.mxu0 %v2615_v15 }
  0xb4   : > { %1301 = vmatprep.subr.bf16.mxu1 %v2612_v14 }
  0xb6   : > { %1327 = vmatpush1.bf16.msra.mxu0 %v2613_v17 }
  0xb7   : > { %1302 = vmatpush2.bf16.msra.mxu1 %v2610_v16  ;;  %1328 = vmatprep.subr.bf16.mxu0 %v2621_v2 }
  0xb8   : > { %1303 = vmatprep.subr.bf16.mxu1 %v2618_v18 }
  0xba   : > { %1329 = vmatpush1.bf16.msra.mxu0 %v2619_v20 }
  0xbb   : > { %1304 = vmatpush2.bf16.msra.mxu1 %v2616_v19  ;;  %1330 = vmatprep.subr.bf16.mxu0 %v2627_v22 }
  0xbc   : > { %1305 = vmatprep.subr.bf16.mxu1 %v2624_v21 }
  0xbe   : > { %1331 = vmatpush1.bf16.msra.mxu0 %v2625_v24 }
  0xbf   : > { %1306 = vmatpush2.bf16.msra.mxu1 %v2622_v23  ;;  %1332 = vmatprep.subr.bf16.mxu0 %v2633_v26 }
  0xc0   : > { %1307 = vmatprep.subr.bf16.mxu1 %v2630_v25 }
  0xc2   : > { %1333 = vmatpush1.bf16.msra.mxu0 %v2631_v28 }
  0xc3   : > { %1308 = vmatpush2.bf16.msra.mxu1 %v2628_v27  ;;  %1334 = vmatprep.subr.bf16.mxu0 %v2639_v30 }
  0xc4   : > { %1309 = vmatprep.subr.bf16.mxu1 %v2636_v29 }
  0xc6   : > { %1335 = vmatpush1.bf16.msra.mxu0 %v2637_v32 }
  0xc7   : > { %1310 = vmatpush2.bf16.msra.mxu1 %v2634_v31  ;;  %1336 = vmatprep.subr.bf16.mxu0 %v2645_v34 }
  0xc8   : > { %1311 = vmatprep.subr.bf16.mxu1 %v2642_v33 }
  0xca   : > { %1337 = vmatpush1.bf16.msra.mxu0 %v2643_v37 }
  0xcb   : > { %1312 = vmatpush2.bf16.msra.mxu1 %v2640_v36 }
  0xcd   : > { %1355 = vmatmul.mubr.bf16.vlgmr.msra.gmra.mxu0 %v3178_v35 }
  0xce   : > { %1314 = vmatmul.mubr.bf16.vlgmr.msra.gmra.mxu1 %v3280_v7 }
 0x14e   : > { %v1274_v38 = vpop.f32.mrf.mxu1 }
 0x150   : > { %v1276_v39 = vpop.f32.mrf.mxu1 }
 0x152   : > { %v1278_v40 = vpop.f32.mrf.mxu1 }
 0x154   : > { %v1279_v41 = vpop.f32.mrf.mxu1 }
 0x16d   : > { %v1233_v42 = vpop.f32.mrf.mxu0 }
 0x16e   : > { %v3376_v43 = vadd.f32 %v1274_v38, %v1233_v42 }
 0x16f   : > { %v1235_v44 = vpop.f32.mrf.mxu0 }
 0x170   : > { %v1365_v45 = vrot.slane %v3376_v43, 4  ;;  %v1393_v46 = vmul.f32 %v3376_v43, %v3376_v43  ;;  %v3381_v47 = vadd.f32 %v1276_v39, %v1235_v44 }
 0x171   : > { %v1237_v48 = vpop.f32.mrf.mxu0 }
 0x172   : > { %v1366_v49 = vadd.f32 %v1365_v45, %v3376_v43  ;;  %v1397_v50 = vrot.slane %v1393_v46, 4  ;;  %v1371_v35 = vrot.slane %v3381_v47, 4  ;;  %v1394_v51 = vmul.f32 %v3381_v47, %v3381_v47 }
 0x173   : > { %v1238_v52 = vpop.f32.mrf.mxu0 }
 0x174   : > { %v1367_v53 = vrot.slane %v1366_v49, 2  ;;  %v1398_v54 = vadd.f32 %v1397_v50, %v1393_v46  ;;  %v1372_v55 = vadd.f32 %v1371_v35, %v3381_v47  ;;  %v1403_v56 = vrot.slane %v1394_v51, 4 }
 0x176   : > { %v1368_v57 = vadd.f32 %v1367_v53, %v1366_v49  ;;  %v1399_v58 = vrot.slane %v1398_v54, 2  ;;  %v1373_v59 = vrot.slane %v1372_v55, 2  ;;  %v1404_v60 = vadd.f32 %v1403_v56, %v1394_v51 }
 0x178   : > { %v1369_v61 = vrot.slane %v1368_v57, 1  ;;  %v1400_v62 = vadd.f32 %v1399_v58, %v1398_v54  ;;  %v1374_v63 = vadd.f32 %v1373_v59, %v1372_v55  ;;  %v1405_v0 = vrot.slane %v1404_v60, 2 }
 0x17a   : > { %v1370_v1 = vadd.f32 %v1369_v61, %v1368_v57  ;;  %v1401_v3 = vrot.slane %v1400_v62, 1  ;;  %v1375_v4 = vrot.slane %v1374_v63, 1  ;;  %v1406_v5 = vadd.f32 %v1405_v0, %v1404_v60 }
 0x17c   : > { %v3388_v6 = vmul.f32 0.125, %v1370_v1  ;;  %v1402_v7 = vadd.f32 %v1401_v3, %v1400_v62  ;;  %v1376_v8 = vadd.f32 %v1375_v4, %v1374_v63  ;;  %v1407_v9 = vrot.slane %v1406_v5, 1 }
 0x17e   : > { %v1421_v10 = vmul.f32 0.125, %v1402_v7  ;;  %v1425_v11 = vmul.f32 %v3388_v6, %v3388_v6  ;;  %v3392_v12 = vmul.f32 0.125, %v1376_v8  ;;  %v1408_v13 = vadd.f32 %v1407_v9, %v1406_v5 }
 0x17f   : > { %v2821_v8 = vmov 1966171168  }
 0x180   : > { %v1429_v14 = vsub.f32 %v1421_v10, %v1425_v11  ;;  %v1422_v15 = vmul.f32 0.125, %v1408_v13  ;;  %v1426_v16 = vmul.f32 %v3392_v12, %v3392_v12  ;;  %v1448_v9 = vunpack.c.l.s4 %v2821_v8 }
 0x181   : > { %v1450_v10 = vlaneseq }
 0x182   : > { %v1430_v17 = vsub.f32 %v1422_v15, %v1426_v16  ;;  %v1433_v18 = vadd.f32 0.001, %v1429_v14  ;;  %v1449_v11 = vunpack.c.0.s8 %v1448_v9 }
 0x183   : > { %v1451_v13 = vshrl.u32 %v1450_v10, 7 }
 0x184   : > { %v1434_v2 = vadd.f32 0.001, %v1430_v17 }
 0x185   : > { %v1452_v15 = vsub.s32 %v1449_v11, %v1451_v13 }
 0x186   : > { %2646 = vrsqrt.f32 %v1434_v2 }
 0x187   : > { %2648 = vrsqrt.f32 %v1433_v18 }
 0x18d   : > { %v1356_v20 = vpop.f32.mrf.mxu0 }
 0x18e   : > { %v1315_v19 = vpop.f32.mrf.mxu1 }
 0x18f   : > { %v3396_v21 = vadd.f32 %v1356_v20, %v1315_v19  ;;  %v1358_v23 = vpop.f32.mrf.mxu0  ;;  %v1363_v20 = vld [vmem:[%s3553_s2] sm:$0xf] }
 0x190   : > { %v1317_v22 = vpop.f32.mrf.mxu1 }
 0x191   : > { %v1377_v24 = vrot.slane %v3396_v21, 4  ;;  %v1395_v25 = vmul.f32 %v3396_v21, %v3396_v21  ;;  %v3401_v26 = vadd.f32 %v1358_v23, %v1317_v22  ;;  %v1360_v28 = vpop.f32.mrf.mxu0  ;;  %v1474_v22 = vsub.s32 0, %v1451_v13 }
 0x192   : > { %v1319_v27 = vpop.f32.mrf.mxu1 }
 0x193   : > { %v1378_v29 = vadd.f32 %v1377_v24, %v3396_v21  ;;  %v1409_v30 = vrot.slane %v1395_v25, 4  ;;  %v1383_v31 = vrot.slane %v3401_v26, 4  ;;  %v1396_v32 = vmul.f32 %v3401_v26, %v3401_v26  ;;  %v2647_v33 = vpop.eup %2646  ;;  %v1361_v36 = vpop.f32.mrf.mxu0 }
 0x194   : > { %v1320_v34 = vpop.f32.mrf.mxu1  ;;  %v2649_v37 = vpop.eup %2648  ;;  %v1478_v24 = vsub.s32 1, %v1451_v13  ;;  %v1486_v27 = vsub.s32 3, %v1451_v13 }
 0x195   : > { %v1379_v38 = vrot.slane %v1378_v29, 2  ;;  %v1410_v39 = vadd.f32 %v1409_v30, %v1395_v25  ;;  %v1384_v40 = vadd.f32 %v1383_v31, %v3401_v26  ;;  %v1415_v41 = vrot.slane %v1396_v32, 4 }
 0x196   : > { %v1445_v42 = vcombine.low %v2649_v37, %v2647_v33  ;;  %v1482_v25 = vsub.s32 2, %v1451_v13 }
 0x197   : > { %v1380_v44 = vadd.f32 %v1379_v38, %v1378_v29  ;;  %v1411_v45 = vrot.slane %v1410_v39, 2  ;;  %v1385_v46 = vrot.slane %v1384_v40, 2  ;;  %v1416_v48 = vadd.f32 %v1415_v41, %v1396_v32 }
 0x198   : > { %v1453_v18 = vrot.slane %v1445_v42, %v1452_v15 }
 0x199   : > { %v1381_v49 = vrot.slane %v1380_v44, 1  ;;  %v1412_v50 = vadd.f32 %v1411_v45, %v1410_v39  ;;  %v1386_v35 = vadd.f32 %v1385_v46, %v1384_v40  ;;  %v1417_v51 = vrot.slane %v1416_v48, 2  ;;  %v1364_v46 = vld [vmem:[%s3554_s3] sm:$0xf] }
 0x19b   : > { %v1382_v52 = vadd.f32 %v1381_v49, %v1380_v44  ;;  %v1413_v53 = vrot.slane %v1412_v50, 1  ;;  %v1387_v54 = vrot.slane %v1386_v35, 1  ;;  %v1418_v55 = vadd.f32 %v1417_v51, %v1416_v48 }
 0x19d   : > { %v1391_v56 = vmul.f32 0.125, %v1382_v52  ;;  %v1414_v57 = vadd.f32 %v1413_v53, %v1412_v50  ;;  %v1388_v58 = vadd.f32 %v1387_v54, %v1386_v35  ;;  %v1419_v59 = vrot.slane %v1418_v55, 1 }
 0x19f   : > { %v1423_v60 = vmul.f32 0.125, %v1414_v57  ;;  %v1427_v61 = vmul.f32 %v1391_v56, %v1391_v56  ;;  %v1392_v62 = vmul.f32 0.125, %v1388_v58  ;;  %v1420_v63 = vadd.f32 %v1419_v59, %v1418_v55 }
 0x1a1   : > { %v1431_v0 = vsub.f32 %v1423_v60, %v1427_v61  ;;  %v1424_v1 = vmul.f32 0.125, %v1420_v63  ;;  %v1428_v3 = vmul.f32 %v1392_v62, %v1392_v62 }
 0x1a3   : > { %v1435_v4 = vadd.f32 0.001, %v1431_v0  ;;  %v1432_v5 = vsub.f32 %v1424_v1, %v1428_v3 }
 0x1a5   : > { %v1436_v7 = vadd.f32 0.001, %v1432_v5  ;;  %2650 = vrsqrt.f32 %v1435_v4 }
 0x1a7   : > { %2652 = vrsqrt.f32 %v1436_v7 }
 0x1b2   : > { %v2651_v14 = vpop.eup %2650 }
 0x1b4   : > { %v2653_v16 = vpop.eup %2652 }
 0x1b5   : > { %v1446_v17 = vcombine.low %v2651_v14, %v2653_v16 }
 0x1b7   : > { %v1460_v2 = vrot.slane %v1446_v17, %v1452_v15 }
 0x1b9   : > { %v1461_v19 = vcombine.low %v1453_v18, %v1460_v2 }
 0x1bb   : > { %v1468_v23 = vrot.slane %v1461_v19, %v1452_v15 }
 0x1bd   : > { %v1470_v28 = vmul.f32 %v1468_v23, %v1363_v20 }
 0x1bf   : > { %v1475_v29 = vrot.slane %v1470_v28, %v1474_v22  ;;  %v1479_v30 = vrot.slane %v1470_v28, %v1478_v24  ;;  %v1483_v31 = vrot.slane %v1470_v28, %v1482_v25  ;;  %v1487_v32 = vrot.slane %v1470_v28, %v1486_v27 }
 0x1c1   : > { %v1492_v33 = vmul.f32 %v1475_v29, %v3388_v6  ;;  %v1493_v34 = vmul.f32 %v1479_v30, %v3392_v12  ;;  %v1494_v36 = vmul.f32 %v1483_v31, %v1391_v56  ;;  %v1495_v37 = vmul.f32 %v1487_v32, %v1392_v62 }
 0x1c2   : > { %v1526_v38 = vmul.f32 %v1475_v29, %v3376_v43  ;;  %v1527_v39 = vmul.f32 %v1479_v30, %v3381_v47  ;;  %v1528_v6 = vmul.f32 %v1483_v31, %v3396_v21  ;;  %v1529_v12 = vmul.f32 %v1487_v32, %v3401_v26 }
 0x1c3   : > { %v1500_v40 = vcombine.low %v1492_v33, %v1493_v34  ;;  %v1501_v41 = vcombine.low %v1494_v36, %v1495_v37 }
 0x1c5   : > { %v1508_v42 = vrot.slane %v1500_v40, %v1452_v15  ;;  %v1515_v44 = vrot.slane %v1501_v41, %v1452_v15 }
 0x1c7   : > { %v1516_v45 = vcombine.low %v1508_v42, %v1515_v44 }
 0x1c9   : > { %v1523_v48 = vrot.slane %v1516_v45, %v1452_v15 }
 0x1cb   : > { %v1525_v49 = vsub.f32 %v1364_v46, %v1523_v48 }
 0x1cd   : > { %v1534_v50 = vrot.slane %v1525_v49, %v1474_v22  ;;  %v1538_v35 = vrot.slane %v1525_v49, %v1478_v24  ;;  %v1542_v43 = vrot.slane %v1525_v49, %v1482_v25  ;;  %v1546_v51 = vrot.slane %v1525_v49, %v1486_v27 }
 0x1cf   : > { %v1551_v47 = vadd.f32 %v1534_v50, %v1526_v38  ;;  %v1552_v52 = vadd.f32 %v1538_v35, %v1527_v39  ;;  %v1553_v53 = vadd.f32 %v1542_v43, %v1528_v6  ;;  %v1554_v54 = vadd.f32 %v1546_v51, %v1529_v12 }
 0x1d1   : > { %v1555_v55 = vmax.f32 %v1551_v47, 0.0  ;;  %v1556_v56 = vmax.f32 %v1552_v52, 0.0  ;;  %v1557_v57 = vmax.f32 %v1553_v53, 0.0  ;;  %v1558_v58 = vmax.f32 %v1554_v54, 0.0 }
 0x1d3   : > { %v2454_v59 = vpack.c.bf16 %v1556_v56, %v1555_v55  ;;  %v2455_v60 = vpack.c.bf16 %v1558_v58, %v1557_v57 }
 0x1d5   : > { %1575 = vst [vmem:[#allocation2] sm:$0xff] %v2454_v59  ;;  %1576 = vst [vmem:[#allocation2 + $0x8] sm:$0xff] %v2455_v60 }
 0x1d6 PF: > { %v2654_v21 = vld [vmem:[%s3067_s16 + $0x74] ss:$8 sps:$4 sm:$0xff]   ;;  %v2658_v61 = vld [vmem:[%s3067_s16 + $0x70] ss:$8 sps:$4 sm:$0xff]   ;;  %v2660_v63 = vld [vmem:[%s3067_s16 + $0x64] ss:$8 sps:$4 sm:$0xff]  }
 0x1d7   : > { %v2656_v26 = vld [vmem:[%s3067_s16 + $0x174] ss:$8 sps:$4 sm:$0xff]   ;;  %1977 = vmatprep.subr.bf16.mxu0 %v2654_v21  ;;  %v2659_v62 = vld [vmem:[%s3067_s16 + $0x170] ss:$8 sps:$4 sm:$0xff]   ;;  %v2662_v0 = vld [vmem:[%s3067_s16 + $0x164] ss:$8 sps:$4 sm:$0xff]  }
 0x1d8   : > { %2018 = vmatprep.subr.bf16.mxu1 %v2656_v26  ;;  %1978 = vmatpush1.bf16.msra.mxu0 %v2658_v61  ;;  %v2664_v1 = vld [vmem:[%s3067_s16 + $0x60] ss:$8 sps:$4 sm:$0xff]   ;;  %v2666_v4 = vld [vmem:[%s3067_s16 + $0x54] ss:$8 sps:$4 sm:$0xff]   ;;  %v2670_v7 = vld [vmem:[%s3067_s16 + $0x50] ss:$8 sps:$4 sm:$0xff]  }
 0x1d9   : > { %2019 = vmatpush1.bf16.msra.mxu1 %v2659_v62  ;;  %1979 = vmatprep.subr.bf16.mxu0 %v2660_v63  ;;  %v2665_v3 = vld [vmem:[%s3067_s16 + $0x160] ss:$8 sps:$4 sm:$0xff]   ;;  %v2668_v5 = vld [vmem:[%s3067_s16 + $0x154] ss:$8 sps:$4 sm:$0xff]   ;;  %v2671_v8 = vld [vmem:[%s3067_s16 + $0x150] ss:$8 sps:$4 sm:$0xff]  }
 0x1da   : > { %2020 = vmatprep.subr.bf16.mxu1 %v2662_v0  ;;  %v2672_v9 = vld [vmem:[%s3067_s16 + $0x44] ss:$8 sps:$4 sm:$0xff]   ;;  %v2676_v11 = vld [vmem:[%s3067_s16 + $0x40] ss:$8 sps:$4 sm:$0xff]   ;;  %v2678_v14 = vld [vmem:[%s3067_s16 + $0x34] ss:$8 sps:$4 sm:$0xff]  }
 0x1db   : > { %v2674_v10 = vld [vmem:[%s3067_s16 + $0x144] ss:$8 sps:$4 sm:$0xff]   ;;  %v2677_v13 = vld [vmem:[%s3067_s16 + $0x140] ss:$8 sps:$4 sm:$0xff]   ;;  %v2680_v15 = vld [vmem:[%s3067_s16 + $0x134] ss:$8 sps:$4 sm:$0xff]  }
 0x1dc   : > { %1980 = vmatpush1.bf16.msra.mxu0 %v2664_v1  ;;  %v2682_v16 = vld [vmem:[%s3067_s16 + $0x30] ss:$8 sps:$4 sm:$0xff]   ;;  %v2684_v18 = vld [vmem:[%s3067_s16 + $0x24] ss:$8 sps:$4 sm:$0xff]   ;;  %v2688_v19 = vld [vmem:[%s3067_s16 + $0x20] ss:$8 sps:$4 sm:$0xff]  }
 0x1dd   : > { %2021 = vmatpush1.bf16.msra.mxu1 %v2665_v3  ;;  %1981 = vmatprep.subr.bf16.mxu0 %v2666_v4  ;;  %v2683_v17 = vld [vmem:[%s3067_s16 + $0x130] ss:$8 sps:$4 sm:$0xff]   ;;  %v2686_v2 = vld [vmem:[%s3067_s16 + $0x124] ss:$8 sps:$4 sm:$0xff]   ;;  %v2689_v20 = vld [vmem:[%s3067_s16 + $0x120] ss:$8 sps:$4 sm:$0xff]  }
 0x1de   : > { %2022 = vmatprep.subr.bf16.mxu1 %v2668_v5  ;;  %v2690_v22 = vld [vmem:[%s3067_s16 + $0x14] ss:$8 sps:$4 sm:$0xff]   ;;  %v2694_v24 = vld [vmem:[%s3067_s16 + $0x10] ss:$8 sps:$4 sm:$0xff]   ;;  %v2696_v27 = vld [vmem:[%s3067_s16 + $0x4] ss:$8 sps:$4 sm:$0xff]  }
 0x1df   : > { %v2692_v23 = vld [vmem:[%s3067_s16 + $0x114] ss:$8 sps:$4 sm:$0xff]   ;;  %v2695_v25 = vld [vmem:[%s3067_s16 + $0x110] ss:$8 sps:$4 sm:$0xff]   ;;  %v2698_v28 = vld [vmem:[%s3067_s16 + $0x104] ss:$8 sps:$4 sm:$0xff]  }
 0x1e0   : > { %1982 = vmatpush1.bf16.msra.mxu0 %v2670_v7  ;;  %v2700_v29 = vld [vmem:[%s3067_s16] ss:$8 sps:$4 sm:$0xff]   ;;  %v2702_v31 = vld [vmem:[%s3067_s16 + $0xf4] ss:$8 sps:$4 sm:$0xff]   ;;  %v2706_v33 = vld [vmem:[%s3067_s16 + $0xf0] ss:$8 sps:$4 sm:$0xff]  }
 0x1e1   : > { %2023 = vmatpush1.bf16.msra.mxu1 %v2671_v8  ;;  %1983 = vmatprep.subr.bf16.mxu0 %v2672_v9  ;;  %v2701_v30 = vld [vmem:[%s3067_s16 + $0x100] ss:$8 sps:$4 sm:$0xff]   ;;  %v2704_v32 = vld [vmem:[%s3067_s16 + $0x1f4] ss:$8 sps:$4 sm:$0xff]   ;;  %v2707_v34 = vld [vmem:[%s3067_s16 + $0x1f0] ss:$8 sps:$4 sm:$0xff]  }
 0x1e2   : > { %2024 = vmatprep.subr.bf16.mxu1 %v2674_v10  ;;  %v2708_v36 = vld [vmem:[%s3067_s16 + $0xe4] ss:$8 sps:$4 sm:$0xff]   ;;  %v2712_v38 = vld [vmem:[%s3067_s16 + $0xe0] ss:$8 sps:$4 sm:$0xff]   ;;  %v2714_v40 = vld [vmem:[%s3067_s16 + $0xd4] ss:$8 sps:$4 sm:$0xff]  }
 0x1e3   : > { %v2710_v37 = vld [vmem:[%s3067_s16 + $0x1e4] ss:$8 sps:$4 sm:$0xff]   ;;  %v2713_v39 = vld [vmem:[%s3067_s16 + $0x1e0] ss:$8 sps:$4 sm:$0xff]   ;;  %v2716_v41 = vld [vmem:[%s3067_s16 + $0x1d4] ss:$8 sps:$4 sm:$0xff]  }
 0x1e4   : > { %1984 = vmatpush1.bf16.msra.mxu0 %v2676_v11  ;;  %v2718_v42 = vld [vmem:[%s3067_s16 + $0xd0] ss:$8 sps:$4 sm:$0xff]   ;;  %v2720_v45 = vld [vmem:[%s3067_s16 + $0xc4] ss:$8 sps:$4 sm:$0xff]   ;;  %v2724_v12 = vld [vmem:[%s3067_s16 + $0xc0] ss:$8 sps:$4 sm:$0xff]  }
 0x1e5   : > { %2025 = vmatpush1.bf16.msra.mxu1 %v2677_v13  ;;  %1985 = vmatprep.subr.bf16.mxu0 %v2678_v14  ;;  %v2719_v44 = vld [vmem:[%s3067_s16 + $0x1d0] ss:$8 sps:$4 sm:$0xff]   ;;  %v2722_v46 = vld [vmem:[%s3067_s16 + $0x1c4] ss:$8 sps:$4 sm:$0xff]   ;;  %v2725_v50 = vld [vmem:[%s3067_s16 + $0x1c0] ss:$8 sps:$4 sm:$0xff]  }
 0x1e6   : > { %2026 = vmatprep.subr.bf16.mxu1 %v2680_v15  ;;  %v1577_v48 = vld [vmem:[#allocation2] sm:$0xff]  ;;  %v1578_v6 = vld [vmem:[#allocation2 + $0x8] sm:$0xff]  ;;  %v2732_v53 = vld [vmem:[%s3067_s16 + $0xa4] ss:$8 sps:$4 sm:$0xff]   ;;  %s2184_s19 = sshll.u32 %s3069_s17, 4  ;;  %s2170_s22 = scalar_lea.sflag [#allocation5], %s3052_s20  ;;  %s2185_s19 = int_to_ptr.vmem [resolvable:$true] %s2184_s19 }
 0x1e7   : > { %v2381_v49 = vcombine.high %v1577_v48, %v1577_v48  ;;  %v2383_v35 = vcombine.high %v1578_v6, %v1578_v6  ;;  %v2726_v43 = vld [vmem:[%s3067_s16 + $0xb4] ss:$8 sps:$4 sm:$0xff]   ;;  %v2730_v47 = vld [vmem:[%s3067_s16 + $0xb0] ss:$8 sps:$4 sm:$0xff]   ;;  %v2734_v54 = vld [vmem:[%s3067_s16 + $0x1a4] ss:$8 sps:$4 sm:$0xff]   ;;  %v2380_v63 = vcombine.low %v1577_v48, %v1577_v48  ;;  %v2382_v0 = vcombine.low %v1578_v6, %v1578_v6 }
 0x1e8   : > { %1986 = vmatpush1.bf16.msra.mxu0 %v2682_v16  ;;  %v2728_v51 = vld [vmem:[%s3067_s16 + $0x1b4] ss:$8 sps:$4 sm:$0xff]   ;;  %v2731_v52 = vld [vmem:[%s3067_s16 + $0x1b0] ss:$8 sps:$4 sm:$0xff]   ;;  %v2736_v55 = vld [vmem:[%s3067_s16 + $0xa0] ss:$8 sps:$4 sm:$0xff]  }
 0x1e9   : > { %2027 = vmatpush1.bf16.msra.mxu1 %v2683_v17  ;;  %1987 = vmatprep.subr.bf16.mxu0 %v2684_v18  ;;  %v2737_v56 = vld [vmem:[%s3067_s16 + $0x1a0] ss:$8 sps:$4 sm:$0xff]   ;;  %v2738_v57 = vld [vmem:[%s3067_s16 + $0x94] ss:$8 sps:$4 sm:$0xff]   ;;  %v2742_v59 = vld [vmem:[%s3067_s16 + $0x90] ss:$8 sps:$4 sm:$0xff]  }
 0x1ea   : > { %2028 = vmatprep.subr.bf16.mxu1 %v2686_v2  ;;  %2009 = vmatprep.mubr.bf16.mxu0 %v2381_v49  ;;  %v2740_v58 = vld [vmem:[%s3067_s16 + $0x194] ss:$8 sps:$4 sm:$0xff]   ;;  %v2743_v60 = vld [vmem:[%s3067_s16 + $0x190] ss:$8 sps:$4 sm:$0xff]   ;;  %v2744_v21 = vld [vmem:[%s3067_s16 + $0x84] ss:$8 sps:$4 sm:$0xff]  }
 0x1eb   : > { %2050 = vmatprep.mubr.bf16.mxu1 %v2383_v35  ;;  %v2746_v26 = vld [vmem:[%s3067_s16 + $0x184] ss:$8 sps:$4 sm:$0xff]   ;;  %v2748_v61 = vld [vmem:[%s3067_s16 + $0x80] ss:$8 sps:$4 sm:$0xff]   ;;  %s2758_s23 = scalar_lea.vmem %s2185_s19, 256 }
 0x1ec   : > { %1988 = vmatpush1.bf16.msra.mxu0 %v2688_v19  ;;  %v2749_v62 = vld [vmem:[%s3067_s16 + $0x180] ss:$8 sps:$4 sm:$0xff]   ;;  %p2759_p1 = scmp.ne.s32.totalorder %s2185_s19, %s2758_s23 }
 0x1ed   : > { %2029 = vmatpush1.bf16.msra.mxu1 %v2689_v20  ;;  %1989 = vmatprep.subr.bf16.mxu0 %v2690_v22 }
 0x1ee   : > { %2030 = vmatprep.subr.bf16.mxu1 %v2692_v23  ;;  %p2760_p2 = pnand %p2759_p1, %p2903_p6 }
 0x1f0   : > { %1990 = vmatpush1.bf16.msra.mxu0 %v2694_v24  ;;  %p2761_p3 = pneg %p2760_p2 }
 0x1f1   : > { %2031 = vmatpush1.bf16.msra.mxu1 %v2695_v25  ;;  %1991 = vmatprep.subr.bf16.mxu0 %v2696_v27 }
 0x1f2   : > { %2032 = vmatprep.subr.bf16.mxu1 %v2698_v28 }
 0x1f4   : > { %1992 = vmatpush1.bf16.msra.mxu0 %v2700_v29 }
 0x1f5   : > { %2033 = vmatpush1.bf16.msra.mxu1 %v2701_v30  ;;  %1993 = vmatprep.subr.bf16.mxu0 %v2702_v31 }
 0x1f6   : > { %2034 = vmatprep.subr.bf16.mxu1 %v2704_v32 }
 0x1f8   : > { %1994 = vmatpush2.bf16.msra.mxu0 %v2706_v33 }
 0x1f9   : > { %2035 = vmatpush2.bf16.msra.mxu1 %v2707_v34  ;;  %1995 = vmatprep.subr.bf16.mxu0 %v2708_v36 }
 0x1fa   : > { %2036 = vmatprep.subr.bf16.mxu1 %v2710_v37 }
 0x1fc   : > { %1996 = vmatpush2.bf16.msra.mxu0 %v2712_v38 }
 0x1fd   : > { %2037 = vmatpush2.bf16.msra.mxu1 %v2713_v39  ;;  %1997 = vmatprep.subr.bf16.mxu0 %v2714_v40 }
 0x1fe   : > { %2038 = vmatprep.subr.bf16.mxu1 %v2716_v41 }
 0x200   : > { %1998 = vmatpush2.bf16.msra.mxu0 %v2718_v42 }
 0x201   : > { %2039 = vmatpush2.bf16.msra.mxu1 %v2719_v44  ;;  %1999 = vmatprep.subr.bf16.mxu0 %v2720_v45 }
 0x202   : > { %2040 = vmatprep.subr.bf16.mxu1 %v2722_v46 }
 0x204   : > { %2000 = vmatpush2.bf16.msra.mxu0 %v2724_v12 }
 0x205   : > { %2041 = vmatpush2.bf16.msra.mxu1 %v2725_v50  ;;  %2001 = vmatprep.subr.bf16.mxu0 %v2726_v43  ;;  %v2822_v43 = vmov 1966171168  }
 0x206   : > { %2042 = vmatprep.subr.bf16.mxu1 %v2728_v51  ;;  %v2103_v51 = vunpack.c.l.s4 %v2822_v43 }
 0x208   : > { %2002 = vmatpush2.bf16.msra.mxu0 %v2730_v47  ;;  %v2105_v47 = vlaneseq }
 0x209   : > { %2043 = vmatpush2.bf16.msra.mxu1 %v2731_v52  ;;  %2003 = vmatprep.subr.bf16.mxu0 %v2732_v53  ;;  %v2104_v52 = vunpack.c.0.s8 %v2103_v51 }
 0x20a   : > { %2044 = vmatprep.subr.bf16.mxu1 %v2734_v54  ;;  %v2106_v53 = vshrl.u32 %v2105_v47, 7 }
 0x20c   : > { %2004 = vmatpush2.bf16.msra.mxu0 %v2736_v55  ;;  %v2107_v55 = vsub.s32 %v2104_v52, %v2106_v53 }
 0x20d   : > { %2045 = vmatpush2.bf16.msra.mxu1 %v2737_v56  ;;  %2005 = vmatprep.subr.bf16.mxu0 %v2738_v57 }
 0x20e   : > { %2046 = vmatprep.subr.bf16.mxu1 %v2740_v58 }
 0x210   : > { %2006 = vmatpush2.bf16.msra.mxu0 %v2742_v59  ;;  %v2059_v59 = vld [vmem:[%s597_s9] sm:$0x3]  ;;  %s2456_s9 = sshll.u32 %s2885_s28, 8  ;;  %s2823_s28 = smov [#allocation4]  }
 0x211   : > { %2047 = vmatpush2.bf16.msra.mxu1 %v2743_v60  ;;  %2007 = vmatprep.subr.bf16.mxu0 %v2744_v21  ;;  %v2125_v21 = vsub.s32 1, %v2106_v53  ;;  %s2762_s8 = sshll.u32 %s2823_s28, 4  ;;  %s2763_s8 = int_to_ptr.vmem [resolvable:$false] %s2762_s8 }
 0x212   : > { %2048 = vmatprep.subr.bf16.mxu1 %v2746_v26  ;;  %v2121_v26 = vsub.s32 0, %v2106_v53  ;;  %s2764_s13 = scalar_lea.vmem %s2763_s8, 512  ;;  %p2765_p4 = scmp.lt.s32.totalorder %s2185_s19, %s2763_s8 }
 0x213   : > { %p2766_p5 = scmp.lt.s32.totalorder %s2764_s13, %s2758_s23 }
 0x214   : > { %2008 = vmatpush2.bf16.msra.mxu0 %v2748_v61 }
 0x215   : > { %2049 = vmatpush2.bf16.msra.mxu1 %v2749_v62  ;;  %p2767_p7 = por %p2766_p5, %p2765_p4 }
 0x217   : > { %2010 = vmatmul.mubr.bf16.vlgmr.msra.gmra.mxu0 %v2380_v63  ;;  %p2768_p9 = pnand %p2767_p7, %p2761_p3 }
 0x218   : > { %2051 = vmatmul.mubr.bf16.vlgmr.msra.gmra.mxu1 %v2382_v0 }
 0x2d7   : > { %v2011_v1 = vpop.f32.mrf.mxu0 }
 0x2d8   : > { %v2052_v3 = vpop.f32.mrf.mxu1 }
 0x2d9   : > { %v3484_v4 = vadd.f32 %v2052_v3, %v2011_v1  ;;  %v2013_v5 = vpop.f32.mrf.mxu0 }
 0x2da   : > { %v2054_v7 = vpop.f32.mrf.mxu1 }
 0x2db   : > { %v2061_v8 = vrot.slane %v3484_v4, 4  ;;  %v2075_v9 = vmul.f32 %v3484_v4, %v3484_v4  ;;  %v3489_v10 = vadd.f32 %v2054_v7, %v2013_v5  ;;  %v2015_v11 = vpop.f32.mrf.mxu0  ;;  %v2060_v7 = vld [vmem:[%s602_s15] sm:$0x3]  ;;  %s3513_s15 = scalar_lea.hbm %s3558_s7, %s2456_s9 }
 0x2dc   : > { %v2056_v13 = vpop.f32.mrf.mxu1 }
 0x2dd   : > { %v2062_v14 = vadd.f32 %v2061_v8, %v3484_v4  ;;  %v2077_v15 = vrot.slane %v2075_v9, 4  ;;  %v2067_v16 = vrot.slane %v3489_v10, 4  ;;  %v2076_v17 = vmul.f32 %v3489_v10, %v3489_v10  ;;  %v2016_v18 = vpop.f32.mrf.mxu0 }
 0x2de   : > { %v2057_v2 = vpop.f32.mrf.mxu1 }
 0x2df   : > { %v2063_v19 = vrot.slane %v2062_v14, 2  ;;  %v2078_v20 = vadd.f32 %v2077_v15, %v2075_v9  ;;  %v2068_v22 = vadd.f32 %v2067_v16, %v3489_v10  ;;  %v2083_v23 = vrot.slane %v2076_v17, 4 }
 0x2e1   : > { %v2064_v24 = vadd.f32 %v2063_v19, %v2062_v14  ;;  %v2079_v25 = vrot.slane %v2078_v20, 2  ;;  %v2069_v27 = vrot.slane %v2068_v22, 2  ;;  %v2084_v28 = vadd.f32 %v2083_v23, %v2076_v17 }
 0x2e3   : > { %v2065_v29 = vrot.slane %v2064_v24, 1  ;;  %v2080_v30 = vadd.f32 %v2079_v25, %v2078_v20  ;;  %v2070_v31 = vadd.f32 %v2069_v27, %v2068_v22  ;;  %v2085_v32 = vrot.slane %v2084_v28, 2 }
 0x2e5   : > { %v2066_v33 = vadd.f32 %v2065_v29, %v2064_v24  ;;  %v2081_v34 = vrot.slane %v2080_v30, 1  ;;  %v2071_v36 = vrot.slane %v2070_v31, 1  ;;  %v2086_v37 = vadd.f32 %v2085_v32, %v2084_v28 }
 0x2e7   : > { %v2073_v38 = vmul.f32 0.125, %v2066_v33  ;;  %v2082_v39 = vadd.f32 %v2081_v34, %v2080_v30  ;;  %v2072_v40 = vadd.f32 %v2071_v36, %v2070_v31  ;;  %v2087_v41 = vrot.slane %v2086_v37, 1 }
 0x2e9   : > { %v2089_v42 = vmul.f32 0.125, %v2082_v39  ;;  %v2091_v44 = vmul.f32 %v2073_v38, %v2073_v38  ;;  %v2074_v45 = vmul.f32 0.125, %v2072_v40  ;;  %v2088_v46 = vadd.f32 %v2087_v41, %v2086_v37 }
 0x2eb   : > { %v2093_v48 = vsub.f32 %v2089_v42, %v2091_v44  ;;  %v2090_v49 = vmul.f32 0.125, %v2088_v46  ;;  %v2092_v6 = vmul.f32 %v2074_v45, %v2074_v45 }
 0x2ed   : > { %v2095_v12 = vadd.f32 0.001, %v2093_v48  ;;  %v2094_v50 = vsub.f32 %v2090_v49, %v2092_v6 }
 0x2ef   : > { %v2096_v35 = vadd.f32 0.001, %v2094_v50  ;;  %2754 = vrsqrt.f32 %v2095_v12 }
 0x2f1   : > { %2756 = vrsqrt.f32 %v2096_v35 }
 0x2fc   : > { %v2755_v54 = vpop.eup %2754 }
 0x2fe   : > { %v2757_v56 = vpop.eup %2756 }
 0x2ff   : > { %v2101_v57 = vcombine.low %v2755_v54, %v2757_v56 }
 0x301   : > { %v2108_v58 = vrot.slane %v2101_v57, %v2107_v55 }
 0x303   : > { %v2115_v60 = vrot.slane %v2108_v58, %v2107_v55 }
 0x305   : > { %v2117_v61 = vmul.f32 %v2115_v60, %v2059_v59 }
 0x307   : > { %v2126_v62 = vrot.slane %v2117_v61, %v2125_v21  ;;  %v2122_v63 = vrot.slane %v2117_v61, %v2121_v26 }
 0x309   : > { %v2130_v0 = vmul.f32 %v2126_v62, %v2074_v45  ;;  %v2129_v1 = vmul.f32 %v2122_v63, %v2073_v38  ;;  %v2151_v11 = vmul.f32 %v2126_v62, %v3489_v10  ;;  %v2150_v13 = vmul.f32 %v2122_v63, %v3484_v4 }
 0x30b   : > { %v2133_v3 = vcombine.low %v2129_v1, %v2130_v0 }
 0x30d   : > { %v2140_v5 = vrot.slane %v2133_v3, %v2107_v55 }
 0x30f   : > { %v2147_v8 = vrot.slane %v2140_v5, %v2107_v55 }
 0x311   : > { %v2149_v9 = vsub.f32 %v2060_v7, %v2147_v8 }
 0x313   : > { %v2156_v14 = vrot.slane %v2149_v9, %v2121_v26  ;;  %v2160_v15 = vrot.slane %v2149_v9, %v2125_v21 }
 0x315   : > { %v2163_v16 = vadd.f32 %v2156_v14, %v2150_v13  ;;  %v2164_v17 = vadd.f32 %v2160_v15, %v2151_v11 }
 0x317   : > { %v2165_v18 = vmax.f32 %v2163_v16, 0.0  ;;  %v2166_v2 = vmax.f32 %v2164_v17, 0.0 }
 0x319   : > { %2167 = vst [vmem:[%s3069_s17] sm:$0xff] %v2165_v18  ;;  %2168 = vst [vmem:[%s3069_s17 + $0x8] sm:$0xff] %v2166_v2 }
 0x31a   : > { %2771 = shalt.err (!%p2768_p9)
}
 0x31b   : > { %s2772_s17 = scalar_lea.hbm %s3513_s15, 256  ;;  %s2776_s16 = scalar_lea.hbm %s3558_s7, 1024 }
 0x31c   : > { %p2773_p10 = scmp.ne.s32.totalorder %s3513_s15, %s2772_s17  ;;  %p2777_p13 = scmp.lt.s32.totalorder %s3513_s15, %s3558_s7 }
 0x31d   : > { %p2778_p0 = scmp.lt.s32.totalorder %s2776_s16, %s2772_s17 }
 0x31e   : > { %p2774_p11 = pnand %p2773_p10, %p2903_p6 }
 0x31f   : > { %p2779_p1 = por %p2778_p0, %p2777_p13 }
 0x320   : > { %p2775_p12 = pneg %p2774_p11 }
 0x322   : > { %p2780_p2 = pnand %p2779_p1, %p2775_p12 }
 0x324   : > { %2783 = shalt.err (!%p2780_p2)
}
 0x325   : > { %2457 = dma.vmem_to_hbm [thread:$0]  (%p2903_p6), %s2185_s19, 256, %s3513_s15, %s2170_s22  }
 0x326 PF: > { %p2463_p3 = scmp.ge.s32.totalorder %s2818_s27, 2  ;;  %s2196_s18 = sand.u32 1, %s2806_s24  }
 0x327   : > { %s2197_s9 = scalar_lea.sflag [#allocation5], %s2196_s18 }
 0x328   : > { %p2460_p4 = pnand %p2463_p3, %p2907_p8 }
 0x32a   : > { %p2461_p5 = pneg %p2460_p4 }
 0x32c   : > { %2801 = dma.done.wait (%p2461_p5), %s2197_s9, 256  }
 0x32d   : > { %2803 = vsyncadd (%p2461_p5), %s2197_s9, 4294967040  ;;  %s3564_s21 = sld [smem:[#allocation7_spill]]  ;;  %p17_p7 = scmp.ge.s32.totalorder %s2889_s30, 6  }
 0x32e   : > { %s3565_s24 = smov %s2810_s25  ;;  %s3566_s25 = smov %s2814_s26 }
 0x32f   : > { %s3568_s27 = smov %s2889_s30  ;;  %19 = sbr.rel (!%p17_p7) target bundleno = 5 (0x5), region = 136 }
 0x333   : > { %s3567_s26 = smov %s3564_s21 }
 0x334   :  { %2202 = vsyncpa [#allocation5], 1 }
 0x335   :  { %2204 = vsyncpa [#allocation5 + $0x1], 1 }

</bundles_post_ra>
